<compile_context>
chip_gen: v7x
topology: tpu7x:2x2x1
jax: 0.10.0
libtpu: 0.0.40
codegen_flags: <defaults>
</compile_context>

<pallas_src>
import functools

import jax
import jax.numpy as jnp
from jax import lax
from jax.experimental import pallas as pl
from jax.experimental.pallas import tpu as pltpu


def _fused_conv_kernel(x_ref, w1_ref, b1p_ref, w2_ref, b2p_ref, o_ref,
                       *, h, w, ho, wo, cin, cmid, cout):
    """One batch image.  x_ref: (Cin,H,W) VMEM.  Params in SMEM.  o_ref: (Cout,Ho,Wo)."""
    f32 = jnp.float32

    # Exact 0/1 selection matrices built in-register (zero HBM traffic):
    #   output row j  <- input row 2*j - 2 ; output col k <- input col 2*k - 2.
    # Rows/cols with no match (j == 0, or beyond the image) select 0, which is
    # exactly what conv1's zero padding contributes at those output positions.
    r_out = lax.broadcasted_iota(jnp.int32, (ho, h), 0)
    r_in = lax.broadcasted_iota(jnp.int32, (ho, h), 1)
    rsel = (r_in == 2 * r_out - 2).astype(f32)               # (Ho, H)
    c_in = lax.broadcasted_iota(jnp.int32, (w, wo), 0)
    c_out = lax.broadcasted_iota(jnp.int32, (w, wo), 1)
    csel = (c_in == 2 * c_out - 2).astype(f32)               # (W, Wo)

    # Output positions where conv2 samples its OWN zero padding (row/col 0, and
    # the last row/col when H/W is odd).
    row = lax.broadcasted_iota(jnp.int32, (ho, wo), 0)
    col = lax.broadcasted_iota(jnp.int32, (ho, wo), 1)
    pad2 = (row == 0) | (2 * row >= h + 3) | (col == 0) | (2 * col >= w + 3)

    # Stride-2 gather of x onto the output grid: xs[c][j,k] = x[c, 2j-2, 2k-2]
    # (exact copy via 0/1 matmuls; 0 where the source pixel is padding).
    xs = []
    for c in range(cin):
        t = jnp.dot(x_ref[c], csel, preferred_element_type=f32)    # (H, Wo)
        xs.append(jnp.dot(rsel, t, preferred_element_type=f32))    # (Ho, Wo)

    # conv1 (1x1) as unrolled scalar FMA + f(v) = 6 / clip(v, 0, 6).
    # The "+3" is pre-folded into b1p.  Positions selecting 0 reproduce
    # f(3 + b1) = conv1-padding value exactly.  Then zero out conv2's padding
    # positions so the second conv sees true zeros there.
    v = []
    for m in range(cmid):
        y = xs[0] * w1_ref[m, 0]
        for c in range(1, cin):
            y = y + xs[c] * w1_ref[m, c]
        y = y + b1p_ref[m]
        act = 6.0 / jnp.clip(y, 0.0, 6.0)    # exact: -> inf when the clamp hits 0
        v.append(jnp.where(pad2, 0.0, act))

    # conv2 (1x1) + activation, stored straight in the final output layout.
    for o in range(cout):
        y = v[0] * w2_ref[o, 0]
        for m in range(1, cmid):
            y = y + v[m] * w2_ref[o, m]
        y = y + b2p_ref[o]
        o_ref[o] = 6.0 / jnp.clip(y, 0.0, 6.0)


def _round_up(a, m):
    return (a + m - 1) // m * m


@jax.jit
def model_forward(x, w1, b1, w2, b2):
    """Pallas implementation of Model.forward.  x: (N, 3, H, W) float32."""
    x = x.astype(jnp.float32)
    n, cin, h, w = x.shape
    cmid = w1.shape[0]                    # 8
    cout = w2.shape[0]                    # 3
    ho = (h + 3) // 2 + 1                 # conv2 output size (pad=1, stride=2 on H+2)
    wo = (w + 3) // 2 + 1

    w1f = w1.reshape(cmid, cin).astype(jnp.float32)
    w2f = w2.reshape(cout, cmid).astype(jnp.float32)
    b1p = (3.0 + b1).astype(jnp.float32)  # fold "+3" into the biases (O(C), free)
    b2p = (3.0 + b2).astype(jnp.float32)

    kernel = functools.partial(_fused_conv_kernel, h=h, w=w, ho=ho, wo=wo,
                               cin=cin, cmid=cmid, cout=cout)

    # Scoped-VMEM budget against the real (8,128)-padded footprint; only raise
    # the limit when large images need it (keep under v7x's 64 MiB physical).
    pad_in = cin * _round_up(h, 8) * _round_up(w, 128)
    pad_out = cout * _round_up(ho, 8) * _round_up(wo, 128)
    pad_tmp = ((cin + cmid + 2) * _round_up(ho, 8) * _round_up(wo, 128)
               + _round_up(ho, 8) * _round_up(h, 128)
               + _round_up(w, 8) * _round_up(wo, 128))
    est_bytes = 4 * (2 * pad_in + 2 * pad_out + pad_tmp)   # double-buffered I/O + temps
    vmem_limit = None if est_bytes <= (24 << 20) else min(2 * est_bytes, 64 << 20)

    smem = pl.BlockSpec(memory_space=pltpu.MemorySpace.SMEM)
    return pl.pallas_call(
        kernel,
        out_shape=jax.ShapeDtypeStruct((n, cout, ho, wo), jnp.float32),
        grid=(n,),
        in_specs=[
            pl.BlockSpec((None, cin, h, w), lambda b: (b, 0, 0, 0)),   # full image / step
            smem,   # w1f  (Cmid, Cin)
            smem,   # b1p  (Cmid,)
            smem,   # w2f  (Cout, Cmid)
            smem,   # b2p  (Cout,)
        ],
        out_specs=pl.BlockSpec((None, cout, ho, wo), lambda b: (b, 0, 0, 0)),
        compiler_params=pltpu.CompilerParams(
            dimension_semantics=("parallel",),
            vmem_limit_bytes=vmem_limit,
        ),
    )(x, w1f, b1p, w2f, b2p)


def reference_forward(x, w1, b1, w2, b2):
    """Pure-JAX reference (mirrors the PyTorch module) for validation."""
    def conv1x1(x, wk, bk, stride, pad):
        xp = jnp.pad(x, ((0, 0), (0, 0), (pad, pad), (pad, pad)))
        xsub = xp[:, :, ::stride, ::stride]
        return jnp.einsum("oc,nchw->nohw", wk, xsub) + bk[None, :, None, None]
    v1 = conv1x1(x, w1.reshape(w1.shape[0], -1), b1, 1, 1)
    v4 = 6.0 / jnp.clip(3.0 + v1, 0.0, 6.0)
    v5 = conv1x1(v4, w2.reshape(w2.shape[0], -1), b2, 2, 1)
    return 6.0 / jnp.clip(3.0 + v5, 0.0, 6.0)


if __name__ == "__main__":
    key = jax.random.PRNGKey(0)
    kx, k1, k2, k3, k4 = jax.random.split(key, 5)

    # Deterministic synthetic parameters: Conv2d(3, 8, 1) and Conv2d(8, 3, 1).
    w1 = 0.1 * jax.random.normal(k1, (8, 3, 1, 1), dtype=jnp.float32)
    b1 = 0.1 * jax.random.normal(k2, (8,), dtype=jnp.float32)
    w2 = 0.1 * jax.random.normal(k3, (3, 8, 1, 1), dtype=jnp.float32)
    b2 = 0.1 * jax.random.normal(k4, (3,), dtype=jnp.float32)

    # Small shapes consistent with the module (batch=2, Cin=3); exercise both an
    # even and an odd spatial size (border / stride index algebra differs).
    for shape, expect in [((2, 3, 16, 16), (2, 3, 10, 10)),
                          ((2, 3, 15, 15), (2, 3, 10, 10))]:
        xk = jax.random.normal(jax.random.fold_in(kx, shape[2]), shape,
                               dtype=jnp.float32)
        out = jax.block_until_ready(model_forward(xk, w1, b1, w2, b2))
        ref = jax.block_until_ready(reference_forward(xk, w1, b1, w2, b2))
        assert out.shape == expect, (out.shape, expect)
        assert jnp.allclose(out, ref, atol=2e-5, rtol=2e-5), f"mismatch at {shape}"
    print("KERNEL_OK")
</pallas_src>

<mosaic_0001>
module attributes {stable_mosaic.version = 11 : i64} {
  func.func @_fused_conv_kernel(%arg0: i32, %arg1: memref<1x3x16x16xf32, #tpu.memory_space<vmem>>, %arg2: memref<8x3xf32, #tpu.memory_space<smem>>, %arg3: memref<8xf32, #tpu.memory_space<smem>>, %arg4: memref<3x8xf32, #tpu.memory_space<smem>>, %arg5: memref<3xf32, #tpu.memory_space<smem>>, %arg6: memref<1x3x10x10xf32, #tpu.memory_space<vmem>>) attributes {dimension_semantics = [#tpu.dimension_semantics<parallel>], iteration_bounds = array<i64: 2>, scalar_prefetch = 0 : i64, scratch_operands = 0 : i64, tpu.core_type = #tpu.core_type<tc>, window_params = [{transform_indices = @transform_0, window_bounds = array<i64: 1, 3, 16, 16>}, {transform_indices = @transform_1, window_bounds = array<i64: 8, 3>}, {transform_indices = @transform_2, window_bounds = array<i64: 8>}, {transform_indices = @transform_3, window_bounds = array<i64: 3, 8>}, {transform_indices = @transform_4, window_bounds = array<i64: 3>}, {transform_indices = @transform_5, window_bounds = array<i64: 1, 3, 10, 10>}]} {
    %0 = tpu.iota {dimensions = array<i32: 0>} : vector<10x16xi32>
    %1 = tpu.iota {dimensions = array<i32: 1>} : vector<10x16xi32>
    %c2_i32 = arith.constant 2 : i32
    %2 = vector.broadcast %c2_i32 : i32 to vector<10x16xi32>
    %3 = arith.muli %2, %0 : vector<10x16xi32>
    %c2_i32_0 = arith.constant 2 : i32
    %4 = vector.broadcast %c2_i32_0 : i32 to vector<10x16xi32>
    %5 = arith.subi %3, %4 : vector<10x16xi32>
    %6 = arith.cmpi eq, %1, %5 : vector<10x16xi32>
    %7 = arith.extui %6 : vector<10x16xi1> to vector<10x16xi32>
    %8 = arith.sitofp %7 : vector<10x16xi32> to vector<10x16xf32>
    %9 = tpu.iota {dimensions = array<i32: 0>} : vector<16x10xi32>
    %10 = tpu.iota {dimensions = array<i32: 1>} : vector<16x10xi32>
    %c2_i32_1 = arith.constant 2 : i32
    %11 = vector.broadcast %c2_i32_1 : i32 to vector<16x10xi32>
    %12 = arith.muli %11, %10 : vector<16x10xi32>
    %c2_i32_2 = arith.constant 2 : i32
    %13 = vector.broadcast %c2_i32_2 : i32 to vector<16x10xi32>
    %14 = arith.subi %12, %13 : vector<16x10xi32>
    %15 = arith.cmpi eq, %9, %14 : vector<16x10xi32>
    %16 = arith.extui %15 : vector<16x10xi1> to vector<16x10xi32>
    %17 = arith.sitofp %16 : vector<16x10xi32> to vector<16x10xf32>
    %18 = tpu.iota {dimensions = array<i32: 0>} : vector<10x10xi32>
    %19 = tpu.iota {dimensions = array<i32: 1>} : vector<10x10xi32>
    %c0_i32 = arith.constant 0 : i32
    %20 = vector.broadcast %c0_i32 : i32 to vector<10x10xi32>
    %21 = arith.cmpi eq, %18, %20 : vector<10x10xi32>
    %c2_i32_3 = arith.constant 2 : i32
    %22 = vector.broadcast %c2_i32_3 : i32 to vector<10x10xi32>
    %23 = arith.muli %22, %18 : vector<10x10xi32>
    %c19_i32 = arith.constant 19 : i32
    %24 = vector.broadcast %c19_i32 : i32 to vector<10x10xi32>
    %25 = arith.cmpi sge, %23, %24 : vector<10x10xi32>
    %26 = arith.ori %21, %25 : vector<10x10xi1>
    %c0_i32_4 = arith.constant 0 : i32
    %27 = vector.broadcast %c0_i32_4 : i32 to vector<10x10xi32>
    %28 = arith.cmpi eq, %19, %27 : vector<10x10xi32>
    %29 = arith.ori %26, %28 : vector<10x10xi1>
    %c2_i32_5 = arith.constant 2 : i32
    %30 = vector.broadcast %c2_i32_5 : i32 to vector<10x10xi32>
    %31 = arith.muli %30, %19 : vector<10x10xi32>
    %c19_i32_6 = arith.constant 19 : i32
    %32 = vector.broadcast %c19_i32_6 : i32 to vector<10x10xi32>
    %33 = arith.cmpi sge, %31, %32 : vector<10x10xi32>
    %34 = arith.ori %29, %33 : vector<10x10xi1>
    %c0 = arith.constant 0 : index
    %c0_7 = arith.constant 0 : index
    %c0_8 = arith.constant 0 : index
    %c0_9 = arith.constant 0 : index
    %35 = vector.load %arg1[%c0, %c0_7, %c0_8, %c0_9] : memref<1x3x16x16xf32, #tpu.memory_space<vmem>>, vector<1x1x16x16xf32>
    %36 = vector.shape_cast %35 : vector<1x1x16x16xf32> to vector<16x16xf32>
    %cst = arith.constant dense<0.000000e+00> : vector<16x10xf32>
    %37 = tpu.matmul %36, %17, %cst {dimension_numbers = #tpu.dot_dimension_numbers<[1], [0], [0], [1], [0, 0, 1, 1], [], []>} : vector<16x16xf32>, vector<16x10xf32>, vector<16x10xf32> -> vector<16x10xf32>
    %cst_10 = arith.constant dense<0.000000e+00> : vector<10x10xf32>
    %38 = tpu.matmul %8, %37, %cst_10 {dimension_numbers = #tpu.dot_dimension_numbers<[1], [0], [0], [1], [0, 0, 1, 1], [], []>} : vector<10x16xf32>, vector<16x10xf32>, vector<10x10xf32> -> vector<10x10xf32>
    %c0_11 = arith.constant 0 : index
    %c1 = arith.constant 1 : index
    %c0_12 = arith.constant 0 : index
    %c0_13 = arith.constant 0 : index
    %39 = vector.load %arg1[%c0_11, %c1, %c0_12, %c0_13] : memref<1x3x16x16xf32, #tpu.memory_space<vmem>>, vector<1x1x16x16xf32>
    %40 = vector.shape_cast %39 : vector<1x1x16x16xf32> to vector<16x16xf32>
    %cst_14 = arith.constant dense<0.000000e+00> : vector<16x10xf32>
    %41 = tpu.matmul %40, %17, %cst_14 {dimension_numbers = #tpu.dot_dimension_numbers<[1], [0], [0], [1], [0, 0, 1, 1], [], []>} : vector<16x16xf32>, vector<16x10xf32>, vector<16x10xf32> -> vector<16x10xf32>
    %cst_15 = arith.constant dense<0.000000e+00> : vector<10x10xf32>
    %42 = tpu.matmul %8, %41, %cst_15 {dimension_numbers = #tpu.dot_dimension_numbers<[1], [0], [0], [1], [0, 0, 1, 1], [], []>} : vector<10x16xf32>, vector<16x10xf32>, vector<10x10xf32> -> vector<10x10xf32>
    %c0_16 = arith.constant 0 : index
    %c2 = arith.constant 2 : index
    %c0_17 = arith.constant 0 : index
    %c0_18 = arith.constant 0 : index
    %43 = vector.load %arg1[%c0_16, %c2, %c0_17, %c0_18] : memref<1x3x16x16xf32, #tpu.memory_space<vmem>>, vector<1x1x16x16xf32>
    %44 = vector.shape_cast %43 : vector<1x1x16x16xf32> to vector<16x16xf32>
    %cst_19 = arith.constant dense<0.000000e+00> : vector<16x10xf32>
    %45 = tpu.matmul %44, %17, %cst_19 {dimension_numbers = #tpu.dot_dimension_numbers<[1], [0], [0], [1], [0, 0, 1, 1], [], []>} : vector<16x16xf32>, vector<16x10xf32>, vector<16x10xf32> -> vector<16x10xf32>
    %cst_20 = arith.constant dense<0.000000e+00> : vector<10x10xf32>
    %46 = tpu.matmul %8, %45, %cst_20 {dimension_numbers = #tpu.dot_dimension_numbers<[1], [0], [0], [1], [0, 0, 1, 1], [], []>} : vector<10x16xf32>, vector<16x10xf32>, vector<10x10xf32> -> vector<10x10xf32>
    %c0_21 = arith.constant 0 : index
    %c0_22 = arith.constant 0 : index
    %47 = memref.load %arg2[%c0_21, %c0_22] : memref<8x3xf32, #tpu.memory_space<smem>>
    %48 = vector.broadcast %47 : f32 to vector<10x10xf32>
    %49 = arith.mulf %38, %48 : vector<10x10xf32>
    %c0_23 = arith.constant 0 : index
    %c1_24 = arith.constant 1 : index
    %50 = memref.load %arg2[%c0_23, %c1_24] : memref<8x3xf32, #tpu.memory_space<smem>>
    %51 = vector.broadcast %50 : f32 to vector<10x10xf32>
    %52 = arith.mulf %42, %51 : vector<10x10xf32>
    %53 = arith.addf %49, %52 : vector<10x10xf32>
    %c0_25 = arith.constant 0 : index
    %c2_26 = arith.constant 2 : index
    %54 = memref.load %arg2[%c0_25, %c2_26] : memref<8x3xf32, #tpu.memory_space<smem>>
    %55 = vector.broadcast %54 : f32 to vector<10x10xf32>
    %56 = arith.mulf %46, %55 : vector<10x10xf32>
    %57 = arith.addf %53, %56 : vector<10x10xf32>
    %c0_27 = arith.constant 0 : index
    %58 = memref.load %arg3[%c0_27] : memref<8xf32, #tpu.memory_space<smem>>
    %59 = vector.broadcast %58 : f32 to vector<10x10xf32>
    %60 = arith.addf %57, %59 : vector<10x10xf32>
    %cst_28 = arith.constant 0.000000e+00 : f32
    %cst_29 = arith.constant 6.000000e+00 : f32
    %61 = vector.broadcast %cst_28 : f32 to vector<10x10xf32>
    %62 = arith.maximumf %61, %60 : vector<10x10xf32>
    %63 = vector.broadcast %cst_29 : f32 to vector<10x10xf32>
    %64 = arith.minimumf %63, %62 : vector<10x10xf32>
    %cst_30 = arith.constant 6.000000e+00 : f32
    %65 = vector.broadcast %cst_30 : f32 to vector<10x10xf32>
    %66 = arith.divf %65, %64 : vector<10x10xf32>
    %cst_31 = arith.constant 0.000000e+00 : f32
    %67 = vector.broadcast %cst_31 : f32 to vector<10x10xf32>
    %68 = arith.select %34, %67, %66 : vector<10x10xi1>, vector<10x10xf32>
    %c1_32 = arith.constant 1 : index
    %c0_33 = arith.constant 0 : index
    %69 = memref.load %arg2[%c1_32, %c0_33] : memref<8x3xf32, #tpu.memory_space<smem>>
    %70 = vector.broadcast %69 : f32 to vector<10x10xf32>
    %71 = arith.mulf %38, %70 : vector<10x10xf32>
    %c1_34 = arith.constant 1 : index
    %c1_35 = arith.constant 1 : index
    %72 = memref.load %arg2[%c1_34, %c1_35] : memref<8x3xf32, #tpu.memory_space<smem>>
    %73 = vector.broadcast %72 : f32 to vector<10x10xf32>
    %74 = arith.mulf %42, %73 : vector<10x10xf32>
    %75 = arith.addf %71, %74 : vector<10x10xf32>
    %c1_36 = arith.constant 1 : index
    %c2_37 = arith.constant 2 : index
    %76 = memref.load %arg2[%c1_36, %c2_37] : memref<8x3xf32, #tpu.memory_space<smem>>
    %77 = vector.broadcast %76 : f32 to vector<10x10xf32>
    %78 = arith.mulf %46, %77 : vector<10x10xf32>
    %79 = arith.addf %75, %78 : vector<10x10xf32>
    %c1_38 = arith.constant 1 : index
    %80 = memref.load %arg3[%c1_38] : memref<8xf32, #tpu.memory_space<smem>>
    %81 = vector.broadcast %80 : f32 to vector<10x10xf32>
    %82 = arith.addf %79, %81 : vector<10x10xf32>
    %cst_39 = arith.constant 0.000000e+00 : f32
    %cst_40 = arith.constant 6.000000e+00 : f32
    %83 = vector.broadcast %cst_39 : f32 to vector<10x10xf32>
    %84 = arith.maximumf %83, %82 : vector<10x10xf32>
    %85 = vector.broadcast %cst_40 : f32 to vector<10x10xf32>
    %86 = arith.minimumf %85, %84 : vector<10x10xf32>
    %cst_41 = arith.constant 6.000000e+00 : f32
    %87 = vector.broadcast %cst_41 : f32 to vector<10x10xf32>
    %88 = arith.divf %87, %86 : vector<10x10xf32>
    %cst_42 = arith.constant 0.000000e+00 : f32
    %89 = vector.broadcast %cst_42 : f32 to vector<10x10xf32>
    %90 = arith.select %34, %89, %88 : vector<10x10xi1>, vector<10x10xf32>
    %c2_43 = arith.constant 2 : index
    %c0_44 = arith.constant 0 : index
    %91 = memref.load %arg2[%c2_43, %c0_44] : memref<8x3xf32, #tpu.memory_space<smem>>
    %92 = vector.broadcast %91 : f32 to vector<10x10xf32>
    %93 = arith.mulf %38, %92 : vector<10x10xf32>
    %c2_45 = arith.constant 2 : index
    %c1_46 = arith.constant 1 : index
    %94 = memref.load %arg2[%c2_45, %c1_46] : memref<8x3xf32, #tpu.memory_space<smem>>
    %95 = vector.broadcast %94 : f32 to vector<10x10xf32>
    %96 = arith.mulf %42, %95 : vector<10x10xf32>
    %97 = arith.addf %93, %96 : vector<10x10xf32>
    %c2_47 = arith.constant 2 : index
    %c2_48 = arith.constant 2 : index
    %98 = memref.load %arg2[%c2_47, %c2_48] : memref<8x3xf32, #tpu.memory_space<smem>>
    %99 = vector.broadcast %98 : f32 to vector<10x10xf32>
    %100 = arith.mulf %46, %99 : vector<10x10xf32>
    %101 = arith.addf %97, %100 : vector<10x10xf32>
    %c2_49 = arith.constant 2 : index
    %102 = memref.load %arg3[%c2_49] : memref<8xf32, #tpu.memory_space<smem>>
    %103 = vector.broadcast %102 : f32 to vector<10x10xf32>
    %104 = arith.addf %101, %103 : vector<10x10xf32>
    %cst_50 = arith.constant 0.000000e+00 : f32
    %cst_51 = arith.constant 6.000000e+00 : f32
    %105 = vector.broadcast %cst_50 : f32 to vector<10x10xf32>
    %106 = arith.maximumf %105, %104 : vector<10x10xf32>
    %107 = vector.broadcast %cst_51 : f32 to vector<10x10xf32>
    %108 = arith.minimumf %107, %106 : vector<10x10xf32>
    %cst_52 = arith.constant 6.000000e+00 : f32
    %109 = vector.broadcast %cst_52 : f32 to vector<10x10xf32>
    %110 = arith.divf %109, %108 : vector<10x10xf32>
    %cst_53 = arith.constant 0.000000e+00 : f32
    %111 = vector.broadcast %cst_53 : f32 to vector<10x10xf32>
    %112 = arith.select %34, %111, %110 : vector<10x10xi1>, vector<10x10xf32>
    %c3 = arith.constant 3 : index
    %c0_54 = arith.constant 0 : index
    %113 = memref.load %arg2[%c3, %c0_54] : memref<8x3xf32, #tpu.memory_space<smem>>
    %114 = vector.broadcast %113 : f32 to vector<10x10xf32>
    %115 = arith.mulf %38, %114 : vector<10x10xf32>
    %c3_55 = arith.constant 3 : index
    %c1_56 = arith.constant 1 : index
    %116 = memref.load %arg2[%c3_55, %c1_56] : memref<8x3xf32, #tpu.memory_space<smem>>
    %117 = vector.broadcast %116 : f32 to vector<10x10xf32>
    %118 = arith.mulf %42, %117 : vector<10x10xf32>
    %119 = arith.addf %115, %118 : vector<10x10xf32>
    %c3_57 = arith.constant 3 : index
    %c2_58 = arith.constant 2 : index
    %120 = memref.load %arg2[%c3_57, %c2_58] : memref<8x3xf32, #tpu.memory_space<smem>>
    %121 = vector.broadcast %120 : f32 to vector<10x10xf32>
    %122 = arith.mulf %46, %121 : vector<10x10xf32>
    %123 = arith.addf %119, %122 : vector<10x10xf32>
    %c3_59 = arith.constant 3 : index
    %124 = memref.load %arg3[%c3_59] : memref<8xf32, #tpu.memory_space<smem>>
    %125 = vector.broadcast %124 : f32 to vector<10x10xf32>
    %126 = arith.addf %123, %125 : vector<10x10xf32>
    %cst_60 = arith.constant 0.000000e+00 : f32
    %cst_61 = arith.constant 6.000000e+00 : f32
    %127 = vector.broadcast %cst_60 : f32 to vector<10x10xf32>
    %128 = arith.maximumf %127, %126 : vector<10x10xf32>
    %129 = vector.broadcast %cst_61 : f32 to vector<10x10xf32>
    %130 = arith.minimumf %129, %128 : vector<10x10xf32>
    %cst_62 = arith.constant 6.000000e+00 : f32
    %131 = vector.broadcast %cst_62 : f32 to vector<10x10xf32>
    %132 = arith.divf %131, %130 : vector<10x10xf32>
    %cst_63 = arith.constant 0.000000e+00 : f32
    %133 = vector.broadcast %cst_63 : f32 to vector<10x10xf32>
    %134 = arith.select %34, %133, %132 : vector<10x10xi1>, vector<10x10xf32>
    %c4 = arith.constant 4 : index
    %c0_64 = arith.constant 0 : index
    %135 = memref.load %arg2[%c4, %c0_64] : memref<8x3xf32, #tpu.memory_space<smem>>
    %136 = vector.broadcast %135 : f32 to vector<10x10xf32>
    %137 = arith.mulf %38, %136 : vector<10x10xf32>
    %c4_65 = arith.constant 4 : index
    %c1_66 = arith.constant 1 : index
    %138 = memref.load %arg2[%c4_65, %c1_66] : memref<8x3xf32, #tpu.memory_space<smem>>
    %139 = vector.broadcast %138 : f32 to vector<10x10xf32>
    %140 = arith.mulf %42, %139 : vector<10x10xf32>
    %141 = arith.addf %137, %140 : vector<10x10xf32>
    %c4_67 = arith.constant 4 : index
    %c2_68 = arith.constant 2 : index
    %142 = memref.load %arg2[%c4_67, %c2_68] : memref<8x3xf32, #tpu.memory_space<smem>>
    %143 = vector.broadcast %142 : f32 to vector<10x10xf32>
    %144 = arith.mulf %46, %143 : vector<10x10xf32>
    %145 = arith.addf %141, %144 : vector<10x10xf32>
    %c4_69 = arith.constant 4 : index
    %146 = memref.load %arg3[%c4_69] : memref<8xf32, #tpu.memory_space<smem>>
    %147 = vector.broadcast %146 : f32 to vector<10x10xf32>
    %148 = arith.addf %145, %147 : vector<10x10xf32>
    %cst_70 = arith.constant 0.000000e+00 : f32
    %cst_71 = arith.constant 6.000000e+00 : f32
    %149 = vector.broadcast %cst_70 : f32 to vector<10x10xf32>
    %150 = arith.maximumf %149, %148 : vector<10x10xf32>
    %151 = vector.broadcast %cst_71 : f32 to vector<10x10xf32>
    %152 = arith.minimumf %151, %150 : vector<10x10xf32>
    %cst_72 = arith.constant 6.000000e+00 : f32
    %153 = vector.broadcast %cst_72 : f32 to vector<10x10xf32>
    %154 = arith.divf %153, %152 : vector<10x10xf32>
    %cst_73 = arith.constant 0.000000e+00 : f32
    %155 = vector.broadcast %cst_73 : f32 to vector<10x10xf32>
    %156 = arith.select %34, %155, %154 : vector<10x10xi1>, vector<10x10xf32>
    %c5 = arith.constant 5 : index
    %c0_74 = arith.constant 0 : index
    %157 = memref.load %arg2[%c5, %c0_74] : memref<8x3xf32, #tpu.memory_space<smem>>
    %158 = vector.broadcast %157 : f32 to vector<10x10xf32>
    %159 = arith.mulf %38, %158 : vector<10x10xf32>
    %c5_75 = arith.constant 5 : index
    %c1_76 = arith.constant 1 : index
    %160 = memref.load %arg2[%c5_75, %c1_76] : memref<8x3xf32, #tpu.memory_space<smem>>
    %161 = vector.broadcast %160 : f32 to vector<10x10xf32>
    %162 = arith.mulf %42, %161 : vector<10x10xf32>
    %163 = arith.addf %159, %162 : vector<10x10xf32>
    %c5_77 = arith.constant 5 : index
    %c2_78 = arith.constant 2 : index
    %164 = memref.load %arg2[%c5_77, %c2_78] : memref<8x3xf32, #tpu.memory_space<smem>>
    %165 = vector.broadcast %164 : f32 to vector<10x10xf32>
    %166 = arith.mulf %46, %165 : vector<10x10xf32>
    %167 = arith.addf %163, %166 : vector<10x10xf32>
    %c5_79 = arith.constant 5 : index
    %168 = memref.load %arg3[%c5_79] : memref<8xf32, #tpu.memory_space<smem>>
    %169 = vector.broadcast %168 : f32 to vector<10x10xf32>
    %170 = arith.addf %167, %169 : vector<10x10xf32>
    %cst_80 = arith.constant 0.000000e+00 : f32
    %cst_81 = arith.constant 6.000000e+00 : f32
    %171 = vector.broadcast %cst_80 : f32 to vector<10x10xf32>
    %172 = arith.maximumf %171, %170 : vector<10x10xf32>
    %173 = vector.broadcast %cst_81 : f32 to vector<10x10xf32>
    %174 = arith.minimumf %173, %172 : vector<10x10xf32>
    %cst_82 = arith.constant 6.000000e+00 : f32
    %175 = vector.broadcast %cst_82 : f32 to vector<10x10xf32>
    %176 = arith.divf %175, %174 : vector<10x10xf32>
    %cst_83 = arith.constant 0.000000e+00 : f32
    %177 = vector.broadcast %cst_83 : f32 to vector<10x10xf32>
    %178 = arith.select %34, %177, %176 : vector<10x10xi1>, vector<10x10xf32>
    %c6 = arith.constant 6 : index
    %c0_84 = arith.constant 0 : index
    %179 = memref.load %arg2[%c6, %c0_84] : memref<8x3xf32, #tpu.memory_space<smem>>
    %180 = vector.broadcast %179 : f32 to vector<10x10xf32>
    %181 = arith.mulf %38, %180 : vector<10x10xf32>
    %c6_85 = arith.constant 6 : index
    %c1_86 = arith.constant 1 : index
    %182 = memref.load %arg2[%c6_85, %c1_86] : memref<8x3xf32, #tpu.memory_space<smem>>
    %183 = vector.broadcast %182 : f32 to vector<10x10xf32>
    %184 = arith.mulf %42, %183 : vector<10x10xf32>
    %185 = arith.addf %181, %184 : vector<10x10xf32>
    %c6_87 = arith.constant 6 : index
    %c2_88 = arith.constant 2 : index
    %186 = memref.load %arg2[%c6_87, %c2_88] : memref<8x3xf32, #tpu.memory_space<smem>>
    %187 = vector.broadcast %186 : f32 to vector<10x10xf32>
    %188 = arith.mulf %46, %187 : vector<10x10xf32>
    %189 = arith.addf %185, %188 : vector<10x10xf32>
    %c6_89 = arith.constant 6 : index
    %190 = memref.load %arg3[%c6_89] : memref<8xf32, #tpu.memory_space<smem>>
    %191 = vector.broadcast %190 : f32 to vector<10x10xf32>
    %192 = arith.addf %189, %191 : vector<10x10xf32>
    %cst_90 = arith.constant 0.000000e+00 : f32
    %cst_91 = arith.constant 6.000000e+00 : f32
    %193 = vector.broadcast %cst_90 : f32 to vector<10x10xf32>
    %194 = arith.maximumf %193, %192 : vector<10x10xf32>
    %195 = vector.broadcast %cst_91 : f32 to vector<10x10xf32>
    %196 = arith.minimumf %195, %194 : vector<10x10xf32>
    %cst_92 = arith.constant 6.000000e+00 : f32
    %197 = vector.broadcast %cst_92 : f32 to vector<10x10xf32>
    %198 = arith.divf %197, %196 : vector<10x10xf32>
    %cst_93 = arith.constant 0.000000e+00 : f32
    %199 = vector.broadcast %cst_93 : f32 to vector<10x10xf32>
    %200 = arith.select %34, %199, %198 : vector<10x10xi1>, vector<10x10xf32>
    %c7 = arith.constant 7 : index
    %c0_94 = arith.constant 0 : index
    %201 = memref.load %arg2[%c7, %c0_94] : memref<8x3xf32, #tpu.memory_space<smem>>
    %202 = vector.broadcast %201 : f32 to vector<10x10xf32>
    %203 = arith.mulf %38, %202 : vector<10x10xf32>
    %c7_95 = arith.constant 7 : index
    %c1_96 = arith.constant 1 : index
    %204 = memref.load %arg2[%c7_95, %c1_96] : memref<8x3xf32, #tpu.memory_space<smem>>
    %205 = vector.broadcast %204 : f32 to vector<10x10xf32>
    %206 = arith.mulf %42, %205 : vector<10x10xf32>
    %207 = arith.addf %203, %206 : vector<10x10xf32>
    %c7_97 = arith.constant 7 : index
    %c2_98 = arith.constant 2 : index
    %208 = memref.load %arg2[%c7_97, %c2_98] : memref<8x3xf32, #tpu.memory_space<smem>>
    %209 = vector.broadcast %208 : f32 to vector<10x10xf32>
    %210 = arith.mulf %46, %209 : vector<10x10xf32>
    %211 = arith.addf %207, %210 : vector<10x10xf32>
    %c7_99 = arith.constant 7 : index
    %212 = memref.load %arg3[%c7_99] : memref<8xf32, #tpu.memory_space<smem>>
    %213 = vector.broadcast %212 : f32 to vector<10x10xf32>
    %214 = arith.addf %211, %213 : vector<10x10xf32>
    %cst_100 = arith.constant 0.000000e+00 : f32
    %cst_101 = arith.constant 6.000000e+00 : f32
    %215 = vector.broadcast %cst_100 : f32 to vector<10x10xf32>
    %216 = arith.maximumf %215, %214 : vector<10x10xf32>
    %217 = vector.broadcast %cst_101 : f32 to vector<10x10xf32>
    %218 = arith.minimumf %217, %216 : vector<10x10xf32>
    %cst_102 = arith.constant 6.000000e+00 : f32
    %219 = vector.broadcast %cst_102 : f32 to vector<10x10xf32>
    %220 = arith.divf %219, %218 : vector<10x10xf32>
    %cst_103 = arith.constant 0.000000e+00 : f32
    %221 = vector.broadcast %cst_103 : f32 to vector<10x10xf32>
    %222 = arith.select %34, %221, %220 : vector<10x10xi1>, vector<10x10xf32>
    %c0_104 = arith.constant 0 : index
    %c0_105 = arith.constant 0 : index
    %223 = memref.load %arg4[%c0_104, %c0_105] : memref<3x8xf32, #tpu.memory_space<smem>>
    %224 = vector.broadcast %223 : f32 to vector<10x10xf32>
    %225 = arith.mulf %68, %224 : vector<10x10xf32>
    %c0_106 = arith.constant 0 : index
    %c1_107 = arith.constant 1 : index
    %226 = memref.load %arg4[%c0_106, %c1_107] : memref<3x8xf32, #tpu.memory_space<smem>>
    %227 = vector.broadcast %226 : f32 to vector<10x10xf32>
    %228 = arith.mulf %90, %227 : vector<10x10xf32>
    %229 = arith.addf %225, %228 : vector<10x10xf32>
    %c0_108 = arith.constant 0 : index
    %c2_109 = arith.constant 2 : index
    %230 = memref.load %arg4[%c0_108, %c2_109] : memref<3x8xf32, #tpu.memory_space<smem>>
    %231 = vector.broadcast %230 : f32 to vector<10x10xf32>
    %232 = arith.mulf %112, %231 : vector<10x10xf32>
    %233 = arith.addf %229, %232 : vector<10x10xf32>
    %c0_110 = arith.constant 0 : index
    %c3_111 = arith.constant 3 : index
    %234 = memref.load %arg4[%c0_110, %c3_111] : memref<3x8xf32, #tpu.memory_space<smem>>
    %235 = vector.broadcast %234 : f32 to vector<10x10xf32>
    %236 = arith.mulf %134, %235 : vector<10x10xf32>
    %237 = arith.addf %233, %236 : vector<10x10xf32>
    %c0_112 = arith.constant 0 : index
    %c4_113 = arith.constant 4 : index
    %238 = memref.load %arg4[%c0_112, %c4_113] : memref<3x8xf32, #tpu.memory_space<smem>>
    %239 = vector.broadcast %238 : f32 to vector<10x10xf32>
    %240 = arith.mulf %156, %239 : vector<10x10xf32>
    %241 = arith.addf %237, %240 : vector<10x10xf32>
    %c0_114 = arith.constant 0 : index
    %c5_115 = arith.constant 5 : index
    %242 = memref.load %arg4[%c0_114, %c5_115] : memref<3x8xf32, #tpu.memory_space<smem>>
    %243 = vector.broadcast %242 : f32 to vector<10x10xf32>
    %244 = arith.mulf %178, %243 : vector<10x10xf32>
    %245 = arith.addf %241, %244 : vector<10x10xf32>
    %c0_116 = arith.constant 0 : index
    %c6_117 = arith.constant 6 : index
    %246 = memref.load %arg4[%c0_116, %c6_117] : memref<3x8xf32, #tpu.memory_space<smem>>
    %247 = vector.broadcast %246 : f32 to vector<10x10xf32>
    %248 = arith.mulf %200, %247 : vector<10x10xf32>
    %249 = arith.addf %245, %248 : vector<10x10xf32>
    %c0_118 = arith.constant 0 : index
    %c7_119 = arith.constant 7 : index
    %250 = memref.load %arg4[%c0_118, %c7_119] : memref<3x8xf32, #tpu.memory_space<smem>>
    %251 = vector.broadcast %250 : f32 to vector<10x10xf32>
    %252 = arith.mulf %222, %251 : vector<10x10xf32>
    %253 = arith.addf %249, %252 : vector<10x10xf32>
    %c0_120 = arith.constant 0 : index
    %254 = memref.load %arg5[%c0_120] : memref<3xf32, #tpu.memory_space<smem>>
    %255 = vector.broadcast %254 : f32 to vector<10x10xf32>
    %256 = arith.addf %253, %255 : vector<10x10xf32>
    %cst_121 = arith.constant 0.000000e+00 : f32
    %cst_122 = arith.constant 6.000000e+00 : f32
    %257 = vector.broadcast %cst_121 : f32 to vector<10x10xf32>
    %258 = arith.maximumf %257, %256 : vector<10x10xf32>
    %259 = vector.broadcast %cst_122 : f32 to vector<10x10xf32>
    %260 = arith.minimumf %259, %258 : vector<10x10xf32>
    %cst_123 = arith.constant 6.000000e+00 : f32
    %261 = vector.broadcast %cst_123 : f32 to vector<10x10xf32>
    %262 = arith.divf %261, %260 : vector<10x10xf32>
    %c0_124 = arith.constant 0 : index
    %c0_125 = arith.constant 0 : index
    %c0_126 = arith.constant 0 : index
    %c0_127 = arith.constant 0 : index
    %263 = vector.load %arg6[%c0_124, %c0_125, %c0_126, %c0_127] : memref<1x3x10x10xf32, #tpu.memory_space<vmem>>, vector<1x1x10x10xf32>
    %264 = vector.shape_cast %263 : vector<1x1x10x10xf32> to vector<10x10xf32>
    %265 = vector.shape_cast %262 : vector<10x10xf32> to vector<1x1x10x10xf32>
    tpu.vector_store %arg6[%c0_124, %c0_125, %c0_126, %c0_127], %265 {strides = array<i32>} : memref<1x3x10x10xf32, #tpu.memory_space<vmem>>, vector<1x1x10x10xf32>,
    %c1_128 = arith.constant 1 : index
    %c0_129 = arith.constant 0 : index
    %266 = memref.load %arg4[%c1_128, %c0_129] : memref<3x8xf32, #tpu.memory_space<smem>>
    %267 = vector.broadcast %266 : f32 to vector<10x10xf32>
    %268 = arith.mulf %68, %267 : vector<10x10xf32>
    %c1_130 = arith.constant 1 : index
    %c1_131 = arith.constant 1 : index
    %269 = memref.load %arg4[%c1_130, %c1_131] : memref<3x8xf32, #tpu.memory_space<smem>>
    %270 = vector.broadcast %269 : f32 to vector<10x10xf32>
    %271 = arith.mulf %90, %270 : vector<10x10xf32>
    %272 = arith.addf %268, %271 : vector<10x10xf32>
    %c1_132 = arith.constant 1 : index
    %c2_133 = arith.constant 2 : index
    %273 = memref.load %arg4[%c1_132, %c2_133] : memref<3x8xf32, #tpu.memory_space<smem>>
    %274 = vector.broadcast %273 : f32 to vector<10x10xf32>
    %275 = arith.mulf %112, %274 : vector<10x10xf32>
    %276 = arith.addf %272, %275 : vector<10x10xf32>
    %c1_134 = arith.constant 1 : index
    %c3_135 = arith.constant 3 : index
    %277 = memref.load %arg4[%c1_134, %c3_135] : memref<3x8xf32, #tpu.memory_space<smem>>
    %278 = vector.broadcast %277 : f32 to vector<10x10xf32>
    %279 = arith.mulf %134, %278 : vector<10x10xf32>
    %280 = arith.addf %276, %279 : vector<10x10xf32>
    %c1_136 = arith.constant 1 : index
    %c4_137 = arith.constant 4 : index
    %281 = memref.load %arg4[%c1_136, %c4_137] : memref<3x8xf32, #tpu.memory_space<smem>>
    %282 = vector.broadcast %281 : f32 to vector<10x10xf32>
    %283 = arith.mulf %156, %282 : vector<10x10xf32>
    %284 = arith.addf %280, %283 : vector<10x10xf32>
    %c1_138 = arith.constant 1 : index
    %c5_139 = arith.constant 5 : index
    %285 = memref.load %arg4[%c1_138, %c5_139] : memref<3x8xf32, #tpu.memory_space<smem>>
    %286 = vector.broadcast %285 : f32 to vector<10x10xf32>
    %287 = arith.mulf %178, %286 : vector<10x10xf32>
    %288 = arith.addf %284, %287 : vector<10x10xf32>
    %c1_140 = arith.constant 1 : index
    %c6_141 = arith.constant 6 : index
    %289 = memref.load %arg4[%c1_140, %c6_141] : memref<3x8xf32, #tpu.memory_space<smem>>
    %290 = vector.broadcast %289 : f32 to vector<10x10xf32>
    %291 = arith.mulf %200, %290 : vector<10x10xf32>
    %292 = arith.addf %288, %291 : vector<10x10xf32>
    %c1_142 = arith.constant 1 : index
    %c7_143 = arith.constant 7 : index
    %293 = memref.load %arg4[%c1_142, %c7_143] : memref<3x8xf32, #tpu.memory_space<smem>>
    %294 = vector.broadcast %293 : f32 to vector<10x10xf32>
    %295 = arith.mulf %222, %294 : vector<10x10xf32>
    %296 = arith.addf %292, %295 : vector<10x10xf32>
    %c1_144 = arith.constant 1 : index
    %297 = memref.load %arg5[%c1_144] : memref<3xf32, #tpu.memory_space<smem>>
    %298 = vector.broadcast %297 : f32 to vector<10x10xf32>
    %299 = arith.addf %296, %298 : vector<10x10xf32>
    %cst_145 = arith.constant 0.000000e+00 : f32
    %cst_146 = arith.constant 6.000000e+00 : f32
    %300 = vector.broadcast %cst_145 : f32 to vector<10x10xf32>
    %301 = arith.maximumf %300, %299 : vector<10x10xf32>
    %302 = vector.broadcast %cst_146 : f32 to vector<10x10xf32>
    %303 = arith.minimumf %302, %301 : vector<10x10xf32>
    %cst_147 = arith.constant 6.000000e+00 : f32
    %304 = vector.broadcast %cst_147 : f32 to vector<10x10xf32>
    %305 = arith.divf %304, %303 : vector<10x10xf32>
    %c0_148 = arith.constant 0 : index
    %c1_149 = arith.constant 1 : index
    %c0_150 = arith.constant 0 : index
    %c0_151 = arith.constant 0 : index
    %306 = vector.load %arg6[%c0_148, %c1_149, %c0_150, %c0_151] : memref<1x3x10x10xf32, #tpu.memory_space<vmem>>, vector<1x1x10x10xf32>
    %307 = vector.shape_cast %306 : vector<1x1x10x10xf32> to vector<10x10xf32>
    %308 = vector.shape_cast %305 : vector<10x10xf32> to vector<1x1x10x10xf32>
    tpu.vector_store %arg6[%c0_148, %c1_149, %c0_150, %c0_151], %308 {strides = array<i32>} : memref<1x3x10x10xf32, #tpu.memory_space<vmem>>, vector<1x1x10x10xf32>,
    %c2_152 = arith.constant 2 : index
    %c0_153 = arith.constant 0 : index
    %309 = memref.load %arg4[%c2_152, %c0_153] : memref<3x8xf32, #tpu.memory_space<smem>>
    %310 = vector.broadcast %309 : f32 to vector<10x10xf32>
    %311 = arith.mulf %68, %310 : vector<10x10xf32>
    %c2_154 = arith.constant 2 : index
    %c1_155 = arith.constant 1 : index
    %312 = memref.load %arg4[%c2_154, %c1_155] : memref<3x8xf32, #tpu.memory_space<smem>>
    %313 = vector.broadcast %312 : f32 to vector<10x10xf32>
    %314 = arith.mulf %90, %313 : vector<10x10xf32>
    %315 = arith.addf %311, %314 : vector<10x10xf32>
    %c2_156 = arith.constant 2 : index
    %c2_157 = arith.constant 2 : index
    %316 = memref.load %arg4[%c2_156, %c2_157] : memref<3x8xf32, #tpu.memory_space<smem>>
    %317 = vector.broadcast %316 : f32 to vector<10x10xf32>
    %318 = arith.mulf %112, %317 : vector<10x10xf32>
    %319 = arith.addf %315, %318 : vector<10x10xf32>
    %c2_158 = arith.constant 2 : index
    %c3_159 = arith.constant 3 : index
    %320 = memref.load %arg4[%c2_158, %c3_159] : memref<3x8xf32, #tpu.memory_space<smem>>
    %321 = vector.broadcast %320 : f32 to vector<10x10xf32>
    %322 = arith.mulf %134, %321 : vector<10x10xf32>
    %323 = arith.addf %319, %322 : vector<10x10xf32>
    %c2_160 = arith.constant 2 : index
    %c4_161 = arith.constant 4 : index
    %324 = memref.load %arg4[%c2_160, %c4_161] : memref<3x8xf32, #tpu.memory_space<smem>>
    %325 = vector.broadcast %324 : f32 to vector<10x10xf32>
    %326 = arith.mulf %156, %325 : vector<10x10xf32>
    %327 = arith.addf %323, %326 : vector<10x10xf32>
    %c2_162 = arith.constant 2 : index
    %c5_163 = arith.constant 5 : index
    %328 = memref.load %arg4[%c2_162, %c5_163] : memref<3x8xf32, #tpu.memory_space<smem>>
    %329 = vector.broadcast %328 : f32 to vector<10x10xf32>
    %330 = arith.mulf %178, %329 : vector<10x10xf32>
    %331 = arith.addf %327, %330 : vector<10x10xf32>
    %c2_164 = arith.constant 2 : index
    %c6_165 = arith.constant 6 : index
    %332 = memref.load %arg4[%c2_164, %c6_165] : memref<3x8xf32, #tpu.memory_space<smem>>
    %333 = vector.broadcast %332 : f32 to vector<10x10xf32>
    %334 = arith.mulf %200, %333 : vector<10x10xf32>
    %335 = arith.addf %331, %334 : vector<10x10xf32>
    %c2_166 = arith.constant 2 : index
    %c7_167 = arith.constant 7 : index
    %336 = memref.load %arg4[%c2_166, %c7_167] : memref<3x8xf32, #tpu.memory_space<smem>>
    %337 = vector.broadcast %336 : f32 to vector<10x10xf32>
    %338 = arith.mulf %222, %337 : vector<10x10xf32>
    %339 = arith.addf %335, %338 : vector<10x10xf32>
    %c2_168 = arith.constant 2 : index
    %340 = memref.load %arg5[%c2_168] : memref<3xf32, #tpu.memory_space<smem>>
    %341 = vector.broadcast %340 : f32 to vector<10x10xf32>
    %342 = arith.addf %339, %341 : vector<10x10xf32>
    %cst_169 = arith.constant 0.000000e+00 : f32
    %cst_170 = arith.constant 6.000000e+00 : f32
    %343 = vector.broadcast %cst_169 : f32 to vector<10x10xf32>
    %344 = arith.maximumf %343, %342 : vector<10x10xf32>
    %345 = vector.broadcast %cst_170 : f32 to vector<10x10xf32>
    %346 = arith.minimumf %345, %344 : vector<10x10xf32>
    %cst_171 = arith.constant 6.000000e+00 : f32
    %347 = vector.broadcast %cst_171 : f32 to vector<10x10xf32>
    %348 = arith.divf %347, %346 : vector<10x10xf32>
    %c0_172 = arith.constant 0 : index
    %c2_173 = arith.constant 2 : index
    %c0_174 = arith.constant 0 : index
    %c0_175 = arith.constant 0 : index
    %349 = vector.load %arg6[%c0_172, %c2_173, %c0_174, %c0_175] : memref<1x3x10x10xf32, #tpu.memory_space<vmem>>, vector<1x1x10x10xf32>
    %350 = vector.shape_cast %349 : vector<1x1x10x10xf32> to vector<10x10xf32>
    %351 = vector.shape_cast %348 : vector<10x10xf32> to vector<1x1x10x10xf32>
    tpu.vector_store %arg6[%c0_172, %c2_173, %c0_174, %c0_175], %351 {strides = array<i32>} : memref<1x3x10x10xf32, #tpu.memory_space<vmem>>, vector<1x1x10x10xf32>,
    return
  }
  func.func @transform_0(%arg0: i32) -> (i32, i32, i32, i32) {
    %c0_i32 = arith.constant 0 : i32
    %c0_i32_0 = arith.constant 0 : i32
    %c0_i32_1 = arith.constant 0 : i32
    %c0_i32_2 = arith.constant 0 : i32
    return %arg0, %c0_i32, %c0_i32_0, %c0_i32_1 : i32, i32, i32, i32
  }
  func.func @transform_1(%arg0: i32) -> (i32, i32) {
    %c0_i32 = arith.constant 0 : i32
    %c0_i32_0 = arith.constant 0 : i32
    %c0_i32_1 = arith.constant 0 : i32
    return %c0_i32, %c0_i32_0 : i32, i32
  }
  func.func @transform_2(%arg0: i32) -> i32 {
    %c0_i32 = arith.constant 0 : i32
    %c0_i32_0 = arith.constant 0 : i32
    return %c0_i32 : i32
  }
  func.func @transform_3(%arg0: i32) -> (i32, i32) {
    %c0_i32 = arith.constant 0 : i32
    %c0_i32_0 = arith.constant 0 : i32
    %c0_i32_1 = arith.constant 0 : i32
    return %c0_i32, %c0_i32_0 : i32, i32
  }
  func.func @transform_4(%arg0: i32) -> i32 {
    %c0_i32 = arith.constant 0 : i32
    %c0_i32_0 = arith.constant 0 : i32
    return %c0_i32 : i32
  }
  func.func @transform_5(%arg0: i32) -> (i32, i32, i32, i32) {
    %c0_i32 = arith.constant 0 : i32
    %c0_i32_0 = arith.constant 0 : i32
    %c0_i32_1 = arith.constant 0 : i32
    %c0_i32_2 = arith.constant 0 : i32
    return %arg0, %c0_i32, %c0_i32_0, %c0_i32_1 : i32, i32, i32, i32
  }
}

</mosaic_0001>

<bundles_post_ra>
// kernel: model_forward.1
= control target key start
LH: loop header
LB: loop body
LE: loop exit
PB: predicated region body
PF: predicated region fallthrough
CT: control target
= control target key end

     0   :  { %s2707_s0 = inlined_call_operand.hbm [shape: f32[2,3,16,16], index: 0, kind: input, shape index: {}]   ;;  %s2708_s1 = inlined_call_operand.vmem [shape: f32[8,3], index: 1, kind: input, shape index: {}]   ;;  %s2709_s2 = inlined_call_operand.vmem [shape: f32[8], index: 2, kind: input, shape index: {}]   ;;  %s2710_s3 = inlined_call_operand.vmem [shape: f32[3,8], index: 3, kind: input, shape index: {}]   ;;  %s2711_s4 = inlined_call_operand.vmem [shape: f32[3], index: 4, kind: input, shape index: {}]   ;;  %s2712_s5 = inlined_call_operand.vmem [shape: f32[2,3,10,10], index: 5, kind: output, shape index: {}]  }
   0x1   :  { %2802 = sst [smem:[#allocation66_spill]] %s2707_s0 }
   0x2   :  { %2803 = sst [smem:[#allocation67_spill]] %s2708_s1 }
   0x3   :  { %2804 = sst [smem:[#allocation68_spill]] %s2709_s2 }
   0x4   :  { %2805 = sst [smem:[#allocation69_spill]] %s2710_s3 }
   0x5   :  { %2806 = sst [smem:[#allocation70_spill]] %s2711_s4 }
   0x6   :  { %2807 = sst [smem:[#allocation71_spill]] %s2712_s5 }
   0x7   :  { %10 = vsyncpa [#allocation3], 0 }
   0x8   :  { %12 = vsyncpa [#allocation3 + $0x1], 0 }
   0x9   :  { %13 = vsyncpa [#allocation4], 0 }
   0xa   :  { %14 = vsyncpa [#allocation7], 0 }
   0xb   :  { %15 = vsyncpa [#allocation10], 0  ;;  %s1850_s18 = smov 0   ;;  %s1852_s19 = smov 0  }
   0xc   :  { %s1854_s20 = smov 0   ;;  %s1856_s21 = smov 0  }
   0xd LB: > { %2808 = sst [smem:[#allocation15_spill]] %s1801_s19  ;;  %s1869_s22 = sadd.s32 4294967295, %s1809_s21   ;;  %s1809_s21 = sphi %s1856_s21, %s3016_s21   ;;  %s1805_s20 = sphi %s1854_s20, %s3019_s20   ;;  %s1801_s19 = sphi %s1852_s19, %s3018_s19   ;;  %s1797_s18 = sphi %s1850_s18, %s3017_s18  }
   0xe   : > { %2809 = sst [smem:[#allocation16_spill]] %s1805_s20  ;;  %p41_p0 = scmp.ne.s32.totalorder %s1801_s19, %s1797_s18 }
   0xf   : > { %2810 = sst [smem:[#allocation17_spill]] %s1869_s22  ;;  %p2713_p1 = scmp.eq.s32.totalorder %s1869_s22, 0 }
  0x10   : > { %p1348_p2 = scmp.ge.s32.totalorder %s1809_s21, 1  ;;  %p162_p3 = scmp.lt.s32.totalorder %s1809_s21, 3 }
  0x11   : > { %p1877_p4 = por %p2713_p1, %p41_p0  ;;  %s2812_s2 = sld [smem:[#allocation68_spill]] }
  0x12   : > { %p1884_p5 = pnand %p1348_p2, %p162_p3  ;;  %s2814_s1 = sld [smem:[#allocation67_spill]] }
  0x13   : > { %s2811_s23 = scalar_select %p1877_p4, 1, 0 }
  0x14   : > { %s2813_s27 = scalar_select %p1884_p5, 1, 0 }
  0x15   : > { %p1563_p6 = pneg %p1884_p5  ;;  %s2816_s3 = sld [smem:[#allocation69_spill]] }
  0x16   : > { %s2817_s4 = sld [smem:[#allocation70_spill]] }
  0x17   : > { %s186_s26 = sshll.u32 %s2812_s2, 4  ;;  %p1895_p7 = pnand %p1563_p6, %p2713_p1  ;;  %s187_s26 = int_to_ptr.vmem [resolvable:$true] %s186_s26 }
  0x18   : > { %s175_s30 = sshll.u32 %s2814_s1, 4  ;;  %s1673_s13 = scalar_lea.vmem %s187_s26, 16  ;;  %s176_s30 = int_to_ptr.vmem [resolvable:$true] %s175_s30 }
  0x19   : > { %p1674_p8 = scmp.ne.s32.totalorder %s187_s26, %s1673_s13  ;;  %p1675_p9 = pneg %p1895_p7 }
  0x1a   : > { %p1681_p12 = scmp.lt.s32.totalorder %s187_s26, %s187_s26  ;;  %p1682_p13 = scmp.lt.s32.totalorder %s1673_s13, %s1673_s13 }
  0x1b   : > { %s197_s9 = sshll.u32 %s2816_s3, 4  ;;  %p1676_p10 = pnand %p1675_p9, %p1674_p8  ;;  %s1902_s9 = int_to_ptr.vmem [resolvable:$true] %s197_s9 }
  0x1c   : > { %s208_s12 = sshll.u32 %s2817_s4, 4  ;;  %p1683_p0 = por %p1682_p13, %p1681_p12  ;;  %s209_s12 = int_to_ptr.vmem [resolvable:$true] %s208_s12 }
  0x1d   : > { %p1677_p11 = pneg %p1676_p10 }
  0x1f   : > { %p1684_p2 = pnand %p1683_p0, %p1677_p11 }
  0x21   : > { %1687 = shalt.err (!%p1684_p2)
}
  0x22   : > { %s1811_s14 = smov [#allocation6]   ;;  %s1688_s15 = scalar_lea.vmem %s176_s30, 128 }
  0x23   : > { %1569 = dma.vmem_to_smem (!%p1895_p7), %s187_s26, 16, %s1811_s14, [#allocation7]  }
  0x24   : > { %p1689_p3 = scmp.ne.s32.totalorder %s176_s30, %s1688_s15  ;;  %p1696_p4 = scmp.lt.s32.totalorder %s176_s30, %s176_s30 }
  0x25   : > { %p1697_p5 = scmp.lt.s32.totalorder %s1688_s15, %s1688_s15 }
  0x26   : > { %p1691_p6 = pnand %p1689_p3, %p1675_p9 }
  0x27   : > { %p1698_p8 = por %p1697_p5, %p1696_p4 }
  0x28   : > { %p1692_p1 = pneg %p1691_p6 }
  0x2a   : > { %p1699_p10 = pnand %p1698_p8, %p1692_p1 }
  0x2c   : > { %1702 = shalt.err (!%p1699_p10)
}
  0x2d   : > { %s1812_s16 = smov [#allocation5]   ;;  %s1703_s17 = scalar_lea.vmem %s1902_s9, 64 }
  0x2e   : > { %1566 = dma.vmem_to_smem (!%p1895_p7), %s176_s30, 128, %s1812_s16, [#allocation4]  }
  0x2f   : > { %p1704_p11 = scmp.ne.s32.totalorder %s1902_s9, %s1703_s17  ;;  %p1711_p0 = scmp.lt.s32.totalorder %s1902_s9, %s1902_s9 }
  0x30   : > { %p1712_p2 = scmp.lt.s32.totalorder %s1703_s17, %s1703_s17 }
  0x31   : > { %p1706_p12 = pnand %p1704_p11, %p1675_p9 }
  0x32   : > { %p1713_p4 = por %p1712_p2, %p1711_p0 }
  0x33   : > { %p1707_p13 = pneg %p1706_p12 }
  0x35   : > { %p1714_p1 = pnand %p1713_p4, %p1707_p13 }
  0x37   : > { %1717 = shalt.err (!%p1714_p1)
}
  0x38   : > { %s1813_s18 = smov [#allocation8]   ;;  %s1718_s26 = scalar_lea.vmem %s209_s12, 16 }
  0x39   : > { %1572 = dma.vmem_to_smem (!%p1895_p7), %s1902_s9, 64, %s1813_s18, [#allocation7]  }
  0x3a   : > { %p1719_p5 = scmp.ne.s32.totalorder %s209_s12, %s1718_s26  ;;  %p1726_p8 = scmp.lt.s32.totalorder %s209_s12, %s209_s12 }
  0x3b   : > { %p1727_p10 = scmp.lt.s32.totalorder %s1718_s26, %s1718_s26 }
  0x3c   : > { %p1721_p3 = pnand %p1719_p5, %p1675_p9 }
  0x3d   : > { %p1728_p11 = por %p1727_p10, %p1726_p8 }
  0x3e   : > { %p1722_p6 = pneg %p1721_p3 }
  0x40   : > { %p1729_p12 = pnand %p1728_p11, %p1722_p6 }
  0x42   : > { %1732 = shalt.err (!%p1729_p12)
}
  0x43   : > { %s1814_s28 = smov [#allocation9]   ;;  %s1939_s29 = sadd.s32 1, %s1809_s21  }
  0x44   : > { %1575 = dma.vmem_to_smem (!%p1895_p7), %s209_s12, 16, %s1814_s28, [#allocation10]  }
  0x45   : > { %2818 = sst [smem:[#allocation18_spill]] %s1939_s29  ;;  %s25_s30 = ssub.s32 %s1809_s21, %s1939_s29 }
  0x46   : > { %p26_p9 = scmp.eq.s32.totalorder %s25_s30, 0  ;;  %s28_s7 = sadd.s32 1, %s1805_s20 }
  0x47   : > { %p35_p13 = scmp.ne.s32.totalorder %s1805_s20, %s1801_s19  ;;  %p36_p0 = scmp.eq.s32.totalorder %s1809_s21, 0 }
  0x48   : > { %s1948_s6 = scalar_select %p26_p9, %s1805_s20, %s28_s7  }
  0x49   : > { %p37_p2 = por %p36_p0, %p35_p13  ;;  %p1584_p4 = scmp.lt.s32.totalorder %s1809_s21, 2 }
  0x4a   : > { %2819 = sst [smem:[#allocation19_spill]] %s1948_s6  ;;  %s219_s8 = sand.u32 1, %s1805_s20  }
  0x4b   : > { %s1542_s9 = smul.u32 768, %s1809_s21  ;;  %s2820_s0 = sld [smem:[#allocation66_spill]] }
  0x4c   : > { %s1541_s10 = smul.u32 48, %s219_s8  ;;  %p1958_p7 = pnand %p1584_p4, %p37_p2 }
  0x4d   : > { %s1964_s21 = scalar_lea.sflag [#allocation3], %s219_s8 }
  0x4e   : > { %s223_s15 = scalar_lea.vmem [#allocation2], %s1541_s10  ;;  %p1735_p5 = pneg %p1958_p7 }
  0x4f   : > { %s230_s16 = sshll.u32 %s223_s15, 4  ;;  %s1962_s16 = int_to_ptr.vmem [resolvable:$true] %s230_s16 }
  0x51   : > { %s1956_s14 = scalar_lea.hbm %s2820_s0, %s1542_s9  ;;  %s1738_s25 = scalar_lea.hbm %s2820_s0, 1536 }
  0x52   : > { %s1733_s17 = scalar_lea.hbm %s1956_s14, 768  ;;  %p1739_p8 = scmp.lt.u32.totalorder %s1956_s14, %s2820_s0 }
  0x53   : > { %p1734_p1 = scmp.ne.s32.totalorder %s1956_s14, %s1733_s17  ;;  %p1740_p10 = scmp.lt.u32.totalorder %s1738_s25, %s1733_s17 }
  0x54   : > { %p1742_p12 = scmp.lt.u32.totalorder %s1733_s17, %s1956_s14 }
  0x55   : > { %p1736_p3 = pnand %p1735_p5, %p1734_p1  ;;  %p1741_p11 = por %p1740_p10, %p1739_p8 }
  0x57   : > { %p1737_p6 = pneg %p1736_p3  ;;  %p1743_p9 = por %p1742_p12, %p1741_p11 }
  0x59   : > { %p1744_p13 = pnand %p1743_p9, %p1737_p6 }
  0x5b   : > { %1747 = shalt.err (!%p1744_p13)
}
  0x5c   : > { %s1748_s30 = scalar_lea.vmem %s1962_s16, 768  ;;  %s1815_s7 = smov [#allocation2]  }
  0x5d   : > { %p1749_p0 = scmp.ne.s32.totalorder %s1962_s16, %s1748_s30  ;;  %s1753_s8 = sshll.u32 %s1815_s7, 4  ;;  %s1754_s8 = int_to_ptr.vmem [resolvable:$false] %s1753_s8 }
  0x5e   : > { %s1755_s9 = scalar_lea.vmem %s1754_s8, 1536  ;;  %p1756_p1 = scmp.lt.s32.totalorder %s1962_s16, %s1754_s8 }
  0x5f   : > { %p1751_p2 = pnand %p1749_p0, %p1735_p5  ;;  %p1757_p3 = scmp.lt.s32.totalorder %s1755_s9, %s1748_s30 }
  0x61   : > { %p1752_p4 = pneg %p1751_p2  ;;  %p1758_p8 = por %p1757_p3, %p1756_p1 }
  0x63   : > { %p1759_p10 = pnand %p1758_p8, %p1752_p4 }
  0x65   : > { %1762 = shalt.err (!%p1759_p10)
}
  0x66   : > { %s1816_s10 = smov 128   ;;  %s1817_s11 = smov 8  }
  0x67   : > { %1579 = dma.hbm_to_vmem [thread:$0]  (!%p1958_p7), %s1956_s14, 768, %s1962_s16, %s1964_s21, %s1816_s10, %s1816_s10, %s1817_s11  }
  0x68   : > { %p2822_p5 = scmp.ne.s32.totalorder %s2813_s27, 0 }
  0x6a   : > { %242 = sbr.rel (%p2822_p5) target bundleno = 682 (0x2aa), region = 40 }
  0x71   : > { %s244_s13 = sand.u32 1, %s1801_s19   ;;  %p2823_p6 = scmp.ne.s32.totalorder %s2811_s23, 0 }
  0x72   : > { %s1543_s15 = smul.u32 48, %s244_s13  ;;  %s245_s17 = scalar_lea.sflag [#allocation3], %s244_s13 }
  0x74   : > { %s1995_s18 = scalar_lea.vmem [#allocation2], %s1543_s15 }
  0x75   : > { %1780 = dma.done.wait (%p2823_p6), %s245_s17, 768  }
  0x76   : > { %1782 = vsyncadd (%p2823_p6), %s245_s17, 4294966528  ;;  %p2824_p11 = scmp.eq.s32.totalorder %s1869_s22, 0 }
  0x78   : > { %1784 = dma.done.wait (%p2824_p11), [#allocation4], 128   ;;  %p2825_p7 = pmov %p2824_p11 }
  0x7a   : > { %1786 = vsyncadd (%p2825_p7), [#allocation4], 4294967168  ;;  %p2826_p12 = pmov %p2825_p7 }
  0x7b   : > { %p2827_p9 = pmov %p2825_p7 }
  0x7c   : > { %1788 = dma.done.wait (%p2826_p12), [#allocation7], 80  }
  0x7d   : > { %1790 = vsyncadd (%p2827_p9), [#allocation7], 4294967216  ;;  %p2828_p13 = pmov %p2825_p7 }
  0x7e   : > { %p2829_p0 = pmov %p2825_p7 }
  0x7f   : > { %1792 = dma.done.wait (%p2828_p13), [#allocation10], 16  }
  0x80   : > { %1794 = vsyncadd (%p2829_p0), [#allocation10], 4294967280 }
  0x81   : > { %269 = sfence }
  0x82   : > { %v297_v0 = vlaneseq  ;;  %v332_v1 = vld [vmem:[%s1995_s18] sm:$0xff]  ;;  %vm334_vm0 = vcmask 130048   ;;  %v1818_v7 = vmov 1.0|1.0   ;;  %v333_v8 = vld [vmem:[%s1995_s18 + $0x8] sm:$0xff]  ;;  %v1374_v9 = vld [vmem:[%s1995_s18 + $0x10] sm:$0xff] }
  0x83   : > { %1479 = vmatprep.mubr.msk.f32.mxu0 %vm334_vm0, %v332_v1  ;;  %v1375_v10 = vld [vmem:[%s1995_s18 + $0x18] sm:$0xff]  ;;  %v1382_v11 = vld [vmem:[%s1995_s18 + $0x20] sm:$0xff]  ;;  %v1383_v12 = vld [vmem:[%s1995_s18 + $0x28] sm:$0xff]  ;;  %v1819_v15 = vmov 0.0   ;;  %s2051_s23 = sld [smem:[#allocation5]]  ;;  %s2067_s26 = sld [smem:[#allocation5 + $0x1]] }
  0x84   : > { %v2015_v2 = vshrl.u32 %v297_v0, 7  ;;  %v2017_v3 = vand.u32 127, %v297_v0  ;;  %s2053_s27 = sld [smem:[#allocation5 + $0x80]]  ;;  %s2069_s28 = sld [smem:[#allocation5 + $0x81]] }
  0x85   : > { %s2055_s14 = sld [smem:[#allocation5 + $0x100]]  ;;  %s2071_s30 = sld [smem:[#allocation5 + $0x101]] }
  0x86   : > { %v2020_v4 = vadd.s32 8, %v2015_v2  ;;  %v312_v5 = vmul.u32 2, %v2017_v3  ;;  %v302_v13 = vmul.u32 2, %v2015_v2  ;;  %s2057_s12 = sld [smem:[#allocation5 + $0x180]]  ;;  %s2073_s7 = sld [smem:[#allocation5 + $0x181]]  ;;  %vm320_vm6 = vcmp.eq.s32.totalorder %v2015_v2, 0 }
  0x87   : > { %s2059_s16 = sld [smem:[#allocation5 + $0x200]]  ;;  %s2075_s8 = sld [smem:[#allocation5 + $0x201]]  ;;  %vm326_vm8 = vcmp.eq.s32.totalorder %v2017_v3, 0 }
  0x88   : > { %v1365_v6 = vadd.s32 4294967294, %v312_v5  ;;  %v1361_v14 = vadd.s32 4294967294, %v302_v13  ;;  %v303_v17 = vmul.u32 2, %v2020_v4  ;;  %s2061_s21 = sld [smem:[#allocation5 + $0x280]]  ;;  %s2077_s9 = sld [smem:[#allocation5 + $0x281]]  ;;  %vm2344_vm7 = vcmp.ge.s32.totalorder %v302_v13, 19 }
  0x89   : > { %2830 = sst [smem:[#allocation20_spill]] %s2051_s23  ;;  %s2063_s24 = sld [smem:[#allocation5 + $0x300]]  ;;  %v816_v29 = vstv %s2051_s23  ;;  %v820_v37 = vstv %s2067_s26  ;;  %vm2375_vm10 = vcmp.ge.s32.totalorder %v312_v5, 19  ;;  %vm324_vm11 = vmor %vm320_vm6, %vm2344_vm7 }
  0x8a   : > { %vm314_vm1 = vcmp.eq.s32.totalorder %v2015_v2, %v1365_v6  ;;  %vm315_vm2 = vcmp.eq.s32.totalorder %v2020_v4, %v1365_v6  ;;  %vm306_vm4 = vcmp.eq.s32.totalorder %v2017_v3, %v1361_v14  ;;  %v1362_v18 = vadd.s32 4294967294, %v303_v17  ;;  %2831 = sst [smem:[#allocation21_spill]] %s2053_s27  ;;  %s2065_s25 = sld [smem:[#allocation5 + $0x380]]  ;;  %vm2424_vm13 = vmor %vm324_vm11, %vm326_vm8 }
  0x8b   : > { %vm1517_vm3 = vmpackc.low %vm315_vm2, %vm314_vm1  ;;  %v1363_v16 = vsel %vm306_vm4, 1.0, %v1819_v15  ;;  %2832 = sst [smem:[#allocation22_spill]] %s2055_s14  ;;  %s2079_s10 = sld [smem:[#allocation5 + $0x301]]  ;;  %v846_v30 = vstv %s2053_s27  ;;  %v876_v31 = vstv %s2055_s14  ;;  %v850_v38 = vstv %s2069_s28 }
  0x8c   : > { %1518 = vmatprep.subr.msk.bf16.mxu0 %vm1517_vm3, %v1818_v7  ;;  %1486 = vmatprep.mubr.msk.f32.mxu1 %vm334_vm0, %v1363_v16  ;;  %vm307_vm5 = vcmp.eq.s32.totalorder %v2017_v3, %v1362_v18  ;;  %2833 = sst [smem:[#allocation23_spill]] %s2057_s12  ;;  %s2081_s11 = sld [smem:[#allocation5 + $0x381]]  ;;  %v906_v32 = vstv %s2057_s12  ;;  %v880_v39 = vstv %s2071_s30  ;;  %v910_v40 = vstv %s2073_s7  ;;  %vm2457_vm15 = vmor %vm2424_vm13, %vm2375_vm10 }
  0x8d   : > { %1520 = vmatpush3.bf16.msk.msra.mxu0 %vm1517_vm3, %v1818_v7  ;;  %v1364_v24 = vsel %vm307_vm5, 1.0, %v1819_v15  ;;  %2834 = sst [smem:[#allocation24_spill]] %s2059_s16  ;;  %s2083_s13 = sld [smem:[#allocation5 + $0x2]]  ;;  %v936_v33 = vstv %s2059_s16  ;;  %v940_v41 = vstv %s2075_s8  ;;  %vm2359_vm9 = vcmp.ge.s32.totalorder %v303_v17, 19 }
  0x8e   : > { %1526 = vmatprep.subr.msk.bf16.mxu0 %vm1517_vm3, %v1818_v7  ;;  %2835 = sst [smem:[#allocation25_spill]] %s2061_s21  ;;  %s2087_s17 = sld [smem:[#allocation6]]  ;;  %v966_v34 = vstv %s2061_s21  ;;  %v970_v42 = vstv %s2077_s9  ;;  %vm2416_vm12 = vmor %vm2359_vm9, %vm326_vm8  ;;  %vm1115_vm1 = vcmask 74752  }
  0x8f   : > { %2836 = sst [smem:[#allocation26_spill]] %s2063_s24  ;;  %s2085_s15 = sld [smem:[#allocation5 + $0x82]]  ;;  %v996_v35 = vstv %s2063_s24  ;;  %vm2446_vm14 = vmor %vm2416_vm12, %vm2375_vm10 }
  0x90   : > { %1480 = vmatmul.mubr.msk.f32.vlgmr.msra.gmra.mrb[0].mxu0 %vm334_vm0, %v333_v8  ;;  %2837 = sst [smem:[#allocation27_spill]] %s2065_s25  ;;  %s2089_s18 = sld [smem:[#allocation5 + $0x102]]  ;;  %v1026_v36 = vstv %s2065_s25 }
  0x91   : > { %1528 = vmatpush3.bf16.msk.msra.mxu0 %vm1517_vm3, %v1818_v7  ;;  %1493 = vmatprep.mubr.msk.f32.mxu0 %vm334_vm0, %v1374_v9  ;;  %2838 = sst [smem:[#allocation28_spill]] %s2067_s26  ;;  %s2091_s0 = sld [smem:[#allocation6 + $0x1]]  ;;  %v1000_v43 = vstv %s2079_s10 }
  0x92   : > { %1534 = vmatprep.subr.msk.bf16.mxu0 %vm1517_vm3, %v1818_v7  ;;  %2839 = sst [smem:[#allocation29_spill]] %s2069_s28  ;;  %s2093_s1 = sld [smem:[#allocation5 + $0x182]]  ;;  %v1030_v44 = vstv %s2081_s11 }
  0x93   : > { %2840 = sst [smem:[#allocation30_spill]] %s2071_s30  ;;  %s2095_s2 = sld [smem:[#allocation6 + $0x2]]  ;;  %v826_v45 = vstv %s2083_s13 }
  0x94   : > { %1494 = vmatmul.mubr.msk.f32.vlgmr.msra.gmra.mrb[2].mxu0 %vm334_vm0, %v1375_v10  ;;  %2841 = sst [smem:[#allocation31_spill]] %s2073_s7  ;;  %s2097_s3 = sld [smem:[#allocation6 + $0x3]]  ;;  %v832_v47 = vstv %s2087_s17 }
  0x95   : > { %1536 = vmatpush3.bf16.msk.msra.mxu0 %vm1517_vm3, %v1818_v7  ;;  %1507 = vmatprep.mubr.msk.f32.mxu0 %vm334_vm0, %v1382_v11  ;;  %2842 = sst [smem:[#allocation32_spill]] %s2075_s8  ;;  %s2099_s4 = sld [smem:[#allocation5 + $0x202]]  ;;  %v856_v46 = vstv %s2085_s15 }
  0x96   : > { %2843 = sst [smem:[#allocation33_spill]] %s2077_s9  ;;  %s2103_s20 = sld [smem:[#allocation6 + $0x4]]  ;;  %v886_v49 = vstv %s2089_s18 }
  0x97   : > { %2844 = sst [smem:[#allocation34_spill]] %s2079_s10  ;;  %s2101_s6 = sld [smem:[#allocation5 + $0x282]]  ;;  %v862_v48 = vstv %s2091_s0 }
  0x98   : > { %1508 = vmatmul.mubr.msk.f32.vlgmr.msra.gmra.mrb[4].mxu0 %vm334_vm0, %v1383_v12  ;;  %2845 = sst [smem:[#allocation35_spill]] %s2081_s11  ;;  %s2105_s19 = sld [smem:[#allocation5 + $0x302]] }
  0x99   : > { %2846 = sst [smem:[#allocation36_spill]] %s2083_s13  ;;  %s2109_s5 = sld [smem:[#allocation5 + $0x382]] }
  0x9a   : > { %2847 = sst [smem:[#allocation37_spill]] %s2085_s15  ;;  %s2107_s29 = sld [smem:[#allocation6 + $0x5]]  ;;  %v922_v52 = vstv %s2097_s3 }
  0x9b   : > { %2848 = sst [smem:[#allocation38_spill]] %s2087_s17  ;;  %s2111_s22 = sld [smem:[#allocation6 + $0x6]] }
  0x9c   : > { %2849 = sst [smem:[#allocation39_spill]] %s2089_s18  ;;  %s2159_s12 = sld [smem:[#allocation8 + $0x101]] }
  0x9d   : > { %2850 = sst [smem:[#allocation40_spill]] %s2091_s0  ;;  %s2157_s27 = sld [smem:[#allocation8 + $0x100]] }
  0x9e   : > { %2851 = sst [smem:[#allocation41_spill]] %s2093_s1  ;;  %s2113_s1 = sld [smem:[#allocation6 + $0x7]] }
  0x9f   : > { %2852 = sst [smem:[#allocation42_spill]] %s2095_s2  ;;  %s2115_s2 = sld [smem:[#allocation8]] }
  0xa0   : > { %2853 = sst [smem:[#allocation43_spill]] %s2097_s3  ;;  %s2873_s16 = sld [smem:[#allocation41_spill]] }
  0xa1   : > { %2854 = sst [smem:[#allocation44_spill]] %s2099_s4  ;;  %s2117_s4 = sld [smem:[#allocation8 + $0x1]]  ;;  %v1012_v59 = vstv %s2111_s22 }
  0xa2   : > { %2855 = sst [smem:[#allocation45_spill]] %s2101_s6  ;;  %s2119_s6 = sld [smem:[#allocation8 + $0x2]] }
  0xa3   : > { %2856 = sst [smem:[#allocation46_spill]] %s2103_s20  ;;  %s2127_s20 = sld [smem:[#allocation8 + $0x6]] }
  0xa4   : > { %2857 = sst [smem:[#allocation47_spill]] %s2105_s19  ;;  %s2121_s19 = sld [smem:[#allocation8 + $0x3]] }
  0xa5   : > { %2858 = sst [smem:[#allocation48_spill]] %s2107_s29  ;;  %s2123_s29 = sld [smem:[#allocation8 + $0x4]] }
  0xa6   : > { %2859 = sst [smem:[#allocation49_spill]] %s2109_s5  ;;  %s2125_s5 = sld [smem:[#allocation8 + $0x5]]  ;;  %v916_v50 = vstv %s2873_s16 }
  0xa7   : > { %2860 = sst [smem:[#allocation50_spill]] %s2113_s1  ;;  %s2129_s1 = sld [smem:[#allocation8 + $0x7]] }
  0xa8   : > { %2861 = sst [smem:[#allocation51_spill]] %s2115_s2  ;;  %s2131_s2 = sld [smem:[#allocation8 + $0x80]] }
  0xa9   : > { %2862 = sst [smem:[#allocation52_spill]] %s2117_s4  ;;  %s2133_s4 = sld [smem:[#allocation8 + $0x81]] }
  0xaa   : > { %2863 = sst [smem:[#allocation53_spill]] %s2119_s6  ;;  %s2135_s6 = sld [smem:[#allocation8 + $0x82]] }
  0xab   : > { %2864 = sst [smem:[#allocation54_spill]] %s2121_s19  ;;  %s2137_s19 = sld [smem:[#allocation8 + $0x83]] }
  0xac   : > { %2865 = sst [smem:[#allocation55_spill]] %s2123_s29  ;;  %s2874_s21 = sld [smem:[#allocation42_spill]] }
  0xad   : > { %2866 = sst [smem:[#allocation56_spill]] %s2125_s5  ;;  %s2141_s5 = sld [smem:[#allocation8 + $0x84]] }
  0xae   : > { %2867 = sst [smem:[#allocation57_spill]] %s2127_s20  ;;  %s2143_s20 = sld [smem:[#allocation8 + $0x85]] }
  0xaf   : > { %2868 = sst [smem:[#allocation58_spill]] %s2129_s1  ;;  %s2165_s14 = sld [smem:[#allocation9]] }
  0xb0   : > { %2869 = sst [smem:[#allocation59_spill]] %s2133_s4  ;;  %s2149_s4 = sld [smem:[#allocation8 + $0x86]] }
  0xb1   : > { %2870 = sst [smem:[#allocation60_spill]] %s2137_s19  ;;  %s2151_s19 = sld [smem:[#allocation8 + $0x87]] }
  0xb2   : > { %2872 = sst [smem:[#allocation62_spill]] %s2159_s12  ;;  %s2876_s24 = sld [smem:[#allocation44_spill]]  ;;  %v892_v51 = vstv %s2874_s21 }
  0xb3   : > { %s2167_s25 = sld [smem:[#allocation8 + $0x102]]  ;;  %s2878_s26 = sld [smem:[#allocation45_spill]] }
  0xb4   : > { %s2879_s28 = sld [smem:[#allocation46_spill]]  ;;  %s2880_s23 = sld [smem:[#allocation48_spill]] }
  0xb5   : > { %2875 = sst [smem:[#allocation42_spill]] %s2165_s14  ;;  %s2882_s30 = sld [smem:[#allocation47_spill]] }
  0xb6   : > { %s2173_s12 = sld [smem:[#allocation8 + $0x103]]  ;;  %s2175_s7 = sld [smem:[#allocation8 + $0x104]] }
  0xb7   : > { %2871 = sst [smem:[#allocation61_spill]] %s2151_s19  ;;  %s2884_s8 = sld [smem:[#allocation49_spill]] }
  0xb8   : > { %s2885_s9 = sld [smem:[#allocation50_spill]]  ;;  %s2886_s14 = sld [smem:[#allocation51_spill]]  ;;  %v946_v53 = vstv %s2876_s24 }
  0xb9   : > { %2877 = sst [smem:[#allocation63_spill]] %s2167_s25  ;;  %s2181_s10 = sld [smem:[#allocation8 + $0x105]]  ;;  %v976_v54 = vstv %s2878_s26 }
  0xba   : > { %s2183_s11 = sld [smem:[#allocation8 + $0x106]]  ;;  %s2189_s0 = sld [smem:[#allocation9 + $0x1]]  ;;  %v952_v55 = vstv %s2879_s28  ;;  %v982_v56 = vstv %s2880_s23 }
  0xbb   : > { %s2191_s17 = sld [smem:[#allocation8 + $0x107]]  ;;  %s2897_s18 = sld [smem:[#allocation60_spill]]  ;;  %v1006_v57 = vstv %s2882_s30 }
  0xbc   : > { %2881 = sst [smem:[#allocation64_spill]] %s2173_s12  ;;  %s2898_s26 = sld [smem:[#allocation62_spill]] }
  0xbd   : > { %2883 = sst [smem:[#allocation47_spill]] %s2175_s7  ;;  %v1036_v58 = vstv %s2884_s8  ;;  %s2944_s22 = sld [smem:[#allocation52_spill]] }
  0xbe   : > { %s2900_s3 = sld [smem:[#allocation63_spill]]  ;;  %s2945_s30 = sld [smem:[#allocation53_spill]] }
  0xbf   : > { %2888 = sst [smem:[#allocation49_spill]] %s2181_s10  ;;  %s2946_s7 = sld [smem:[#allocation54_spill]] }
  0xc0   : > { %2890 = sst [smem:[#allocation50_spill]] %s2183_s11  ;;  %s2959_s8 = sld [smem:[#allocation55_spill]] }
  0xc1   : > { %2894 = sst [smem:[#allocation51_spill]] %s2189_s0  ;;  %s2648_s10 = sld [smem:[#allocation9 + $0x2]] }
  0xc2   : > { %2895 = sst [smem:[#allocation65_spill]] %s2191_s17  ;;  %s3001_s11 = sld [smem:[#allocation17_spill]] }
  0xc3   : > { %s3005_s13 = sld [smem:[#allocation50_spill]]  ;;  %s3010_s15 = sld [smem:[#allocation65_spill]] }
  0xc4   : > { %s3015_s29 = sld [smem:[#allocation71_spill]] }
  0xc8   : > { %p292_p2 = scmp.lt.s32.totalorder %s3001_s11, 1 }
  0xca   : > { %s3021_s11 = smov (!%p292_p2, %s3001_s11), 1 }
  0xcb   : > { %s1544_s17 = smul.u32 48, %s3021_s11 }
  0xcd   : > { %s296_s12 = scalar_lea.vmem %s3015_s29, %s1544_s17 }
 0x163   : > { %v1481_v19 = vpop.f32.mrb[0].mxu0 }
 0x164   : > { %v407_v20 = vpop.f32.mrb[1].mxu0 }
 0x165   : > { %v1521_v21 = vpack.c.bf16 %v1481_v19, %v407_v20 }
 0x167   : > { %1522 = vmatprep.subr.bf16.mxu1 %v1521_v21  ;;  %v1495_v22 = vpop.f32.mrb[2].mxu0 }
 0x168   : > { %1524 = vmatpush3.bf16.msra.mxu1 %v1521_v21  ;;  %v572_v23 = vpop.f32.mrb[3].mxu0 }
 0x169   : > { %v1529_v25 = vpack.c.bf16 %v1495_v22, %v572_v23 }
 0x16b   : > { %1487 = vmatmul.mubr.msk.f32.vlgmr.msra.gmra.mrb[0].mxu1 %vm334_vm0, %v1364_v24  ;;  %1530 = vmatprep.subr.bf16.mxu1 %v1529_v25  ;;  %v1509_v26 = vpop.f32.mrb[4].mxu0 }
 0x16c   : > { %1532 = vmatpush3.bf16.msra.mxu1 %v1529_v25  ;;  %v731_v27 = vpop.f32.mrb[5].mxu0  ;;  %1500 = vmatprep.mubr.msk.f32.mxu1 %vm334_vm0, %v1363_v16 }
 0x16d   : > { %v1537_v28 = vpack.c.bf16 %v1509_v26, %v731_v27 }
 0x16f   : > { %1501 = vmatmul.mubr.msk.f32.vlgmr.msra.gmra.mrb[2].mxu1 %vm334_vm0, %v1364_v24  ;;  %1538 = vmatprep.subr.bf16.mxu1 %v1537_v28 }
 0x170   : > { %1540 = vmatpush3.bf16.msra.mxu1 %v1537_v28  ;;  %1514 = vmatprep.mubr.msk.f32.mxu1 %vm334_vm0, %v1363_v16 }
 0x173   : > { %1515 = vmatmul.mubr.msk.f32.vlgmr.msra.gmra.mrb[4].mxu1 %vm334_vm0, %v1364_v24  ;;  %vm1113_vm0 = vcmask 80896  }
 0x23e   : > { %v1488_v25 = vpop.f32.mrb[0].mxu1 }
 0x23f   : > { %v818_v8 = vmul.f32 %v1488_v25, %v816_v29  ;;  %v848_v21 = vmul.f32 %v1488_v25, %v846_v30  ;;  %v878_v23 = vmul.f32 %v1488_v25, %v876_v31  ;;  %v908_v24 = vmul.f32 %v1488_v25, %v906_v32  ;;  %v488_v22 = vpop.f32.mrb[1].mxu1 }
 0x240   : > { %v2235_v27 = vmul.f32 %v1488_v25, %v936_v33  ;;  %v2239_v18 = vmul.f32 %v1488_v25, %v966_v34  ;;  %v2243_v28 = vmul.f32 %v1488_v25, %v996_v35  ;;  %v2247_v26 = vmul.f32 %v1488_v25, %v1026_v36 }
 0x241   : > { %v817_v20 = vmul.f32 %v816_v29, %v488_v22  ;;  %v847_v19 = vmul.f32 %v846_v30, %v488_v22  ;;  %v877_v16 = vmul.f32 %v876_v31, %v488_v22  ;;  %v907_v15 = vmul.f32 %v906_v32, %v488_v22 }
 0x242   : > { %v2259_v14 = vmul.f32 %v936_v33, %v488_v22  ;;  %v2263_v25 = vmul.f32 %v966_v34, %v488_v22  ;;  %v2267_v29 = vmul.f32 %v996_v35, %v488_v22  ;;  %v2271_v30 = vmul.f32 %v1026_v36, %v488_v22  ;;  %v1502_v31 = vpop.f32.mrb[2].mxu1 }
 0x243   : > { %v822_v32 = vmul.f32 %v1502_v31, %v820_v37  ;;  %v852_v33 = vmul.f32 %v1502_v31, %v850_v38  ;;  %v882_v12 = vmul.f32 %v1502_v31, %v880_v39  ;;  %v912_v34 = vmul.f32 %v1502_v31, %v910_v40  ;;  %v647_v7 = vpop.f32.mrb[3].mxu1 }
 0x244   : > { %v2283_v35 = vmul.f32 %v1502_v31, %v940_v41  ;;  %v2287_v36 = vmul.f32 %v1502_v31, %v970_v42  ;;  %v2291_v22 = vmul.f32 %v1502_v31, %v1000_v43  ;;  %v2295_v11 = vmul.f32 %v1502_v31, %v1030_v44 }
 0x245   : > { %v821_v6 = vmul.f32 %v820_v37, %v647_v7  ;;  %v851_v1 = vmul.f32 %v850_v38, %v647_v7  ;;  %v881_v10 = vmul.f32 %v880_v39, %v647_v7  ;;  %v911_v9 = vmul.f32 %v910_v40, %v647_v7 }
 0x246   : > { %v941_v0 = vmul.f32 %v940_v41, %v647_v7  ;;  %v2309_v63 = vmul.f32 %v970_v42, %v647_v7  ;;  %v2313_v62 = vmul.f32 %v1000_v43, %v647_v7  ;;  %v2317_v31 = vmul.f32 %v1030_v44, %v647_v7  ;;  %v2319_v37 = vpop.f32.mrb[4].mxu1 }
 0x247   : > { %v2321_v38 = vpop.f32.mrb[5].mxu1  ;;  %v823_v39 = vadd.f32 %v821_v6, %v817_v20  ;;  %v824_v60 = vadd.f32 %v822_v32, %v818_v8  ;;  %v828_v40 = vmul.f32 %v2319_v37, %v826_v45  ;;  %v853_v41 = vadd.f32 %v851_v1, %v847_v19 }
 0x248   : > { %v827_v42 = vmul.f32 %v826_v45, %v2321_v38  ;;  %v854_v43 = vadd.f32 %v852_v33, %v848_v21  ;;  %v857_v44 = vmul.f32 %v856_v46, %v2321_v38  ;;  %v858_v7 = vmul.f32 %v2319_v37, %v856_v46 }
 0x249   : > { %v830_v61 = vadd.f32 %v828_v40, %v824_v60  ;;  %v883_v6 = vadd.f32 %v881_v10, %v877_v16  ;;  %v884_v8 = vadd.f32 %v882_v12, %v878_v23  ;;  %v887_v20 = vmul.f32 %v886_v49, %v2321_v38 }
 0x24a   : > { %v829_v1 = vadd.f32 %v827_v42, %v823_v39  ;;  %v859_v19 = vadd.f32 %v857_v44, %v853_v41  ;;  %v860_v45 = vadd.f32 %v858_v7, %v854_v43  ;;  %v888_v21 = vmul.f32 %v2319_v37, %v886_v49 }
 0x24b   : > { %v834_v60 = vadd.f32 %v832_v47, %v830_v61  ;;  %v889_v10 = vadd.f32 %v887_v20, %v883_v6  ;;  %v913_v12 = vadd.f32 %v911_v9, %v907_v15  ;;  %v914_v16 = vadd.f32 %v912_v34, %v908_v24 }
 0x24c   : > { %v833_v23 = vadd.f32 %v832_v47, %v829_v1  ;;  %v863_v32 = vadd.f32 %v862_v48, %v859_v19  ;;  %v864_v49 = vadd.f32 %v862_v48, %v860_v45  ;;  %v890_v33 = vadd.f32 %v888_v21, %v884_v8 }
 0x24d   : > { %v836_v61 = vmax.f32 %v834_v60, 0.0  ;;  %v893_v39 = vadd.f32 %v892_v51, %v889_v10  ;;  %v917_v9 = vmul.f32 %v916_v50, %v2321_v38  ;;  %v918_v47 = vmul.f32 %v2319_v37, %v916_v50 }
 0x24e   : > { %v835_v48 = vmax.f32 %v833_v23, 0.0  ;;  %v865_v15 = vmax.f32 %v863_v32, 0.0  ;;  %v866_v24 = vmax.f32 %v864_v49, 0.0  ;;  %v894_v4 = vadd.f32 %v892_v51, %v890_v33 }
 0x24f   : > { %v838_v17 = vmin.f32 %v836_v61, 6.0  ;;  %v895_v34 = vmax.f32 %v893_v39, 0.0  ;;  %v919_v40 = vadd.f32 %v917_v9, %v913_v12  ;;  %v920_v41 = vadd.f32 %v918_v47, %v914_v16 }
 0x250   : > { %v837_v43 = vmin.f32 %v835_v48, 6.0  ;;  %v867_v50 = vmin.f32 %v865_v15, 6.0  ;;  %v868_v44 = vmin.f32 %v866_v24, 6.0  ;;  %v896_v7 = vmax.f32 %v894_v4, 0.0 }
 0x251   : > { %1629 = vrcp.f32 %v838_v17  ;;  %v897_v6 = vmin.f32 %v895_v34, 6.0  ;;  %v923_v51 = vadd.f32 %v922_v52, %v919_v40  ;;  %v924_v8 = vadd.f32 %v922_v52, %v920_v41 }
 0x252   : > { %1631 = vrcp.f32 %v837_v43  ;;  %v898_v20 = vmin.f32 %v896_v7, 6.0  ;;  %v943_v1 = vadd.f32 %v941_v0, %v2259_v14  ;;  %v944_v5 = vadd.f32 %v2283_v35, %v2235_v27 }
 0x253   : > { %1633 = vrcp.f32 %v867_v50  ;;  %v925_v19 = vmax.f32 %v923_v51, 0.0  ;;  %v926_v45 = vmax.f32 %v924_v8, 0.0  ;;  %v947_v21 = vmul.f32 %v946_v53, %v2321_v38 }
 0x254   : > { %1635 = vrcp.f32 %v868_v44  ;;  %v948_v52 = vmul.f32 %v2319_v37, %v946_v53  ;;  %v973_v60 = vadd.f32 %v2309_v63, %v2263_v25  ;;  %v974_v0 = vadd.f32 %v2287_v36, %v2239_v18 }
 0x255   : > { %1637 = vrcp.f32 %v897_v6  ;;  %v927_v14 = vmin.f32 %v925_v19, 6.0  ;;  %v928_v27 = vmin.f32 %v926_v45, 6.0  ;;  %v949_v35 = vadd.f32 %v947_v21, %v943_v1 }
 0x256   : > { %1639 = vrcp.f32 %v898_v20  ;;  %v950_v53 = vadd.f32 %v948_v52, %v944_v5  ;;  %v977_v63 = vmul.f32 %v976_v54, %v2321_v38  ;;  %v978_v18 = vmul.f32 %v2319_v37, %v976_v54 }
 0x257   : > { %1641 = vrcp.f32 %v927_v14  ;;  %v953_v25 = vadd.f32 %v952_v55, %v949_v35  ;;  %v1003_v36 = vadd.f32 %v2313_v62, %v2267_v29  ;;  %v1004_v2 = vadd.f32 %v2291_v22, %v2243_v28 }
 0x258   : > { %1643 = vrcp.f32 %v928_v27  ;;  %v954_v54 = vadd.f32 %v952_v55, %v950_v53  ;;  %v979_v10 = vadd.f32 %v977_v63, %v973_v60  ;;  %v980_v12 = vadd.f32 %v978_v18, %v974_v0 }
 0x259   : > { %v955_v28 = vmax.f32 %v953_v25, 0.0  ;;  %v1007_v29 = vmul.f32 %v1006_v57, %v2321_v38  ;;  %v1008_v22 = vmul.f32 %v2319_v37, %v1006_v57  ;;  %v1033_v16 = vadd.f32 %v2317_v31, %v2271_v30 }
 0x25a   : > { %v956_v55 = vmax.f32 %v954_v54, 0.0  ;;  %v983_v23 = vadd.f32 %v982_v56, %v979_v10  ;;  %v984_v32 = vadd.f32 %v982_v56, %v980_v12  ;;  %v1034_v3 = vadd.f32 %v2295_v11, %v2247_v26 }
 0x25b   : > { %v1630_v49 = vpop.eup %1629  ;;  %v957_v30 = vmin.f32 %v955_v28, 6.0  ;;  %v1009_v31 = vadd.f32 %v1007_v29, %v1003_v36  ;;  %v1010_v33 = vadd.f32 %v1008_v22, %v1004_v2  ;;  %v1037_v56 = vmul.f32 %v1036_v58, %v2321_v38 }
 0x25c   : > { %v1632_v13 = vpop.eup %1631  ;;  %v842_v26 = vmul.f32 6.0, %v1630_v49  ;;  %v958_v61 = vmin.f32 %v956_v55, 6.0  ;;  %v985_v39 = vmax.f32 %v983_v23, 0.0  ;;  %v986_v9 = vmax.f32 %v984_v32, 0.0 }
 0x25d   : > { %v1634_v47 = vpop.eup %1633  ;;  %v840_v48 = vmul.f32 6.0, %v1632_v13  ;;  %1645 = vrcp.f32 %v957_v30  ;;  %v1013_v15 = vadd.f32 %v1012_v59, %v1009_v31  ;;  %v1014_v38 = vadd.f32 %v1012_v59, %v1010_v33 }
 0x25e   : > { %v1636_v24 = vpop.eup %1635  ;;  %v2467_v4 = vsel %vm2446_vm14, 0.0, %v842_v26  ;;  %v870_v17 = vmul.f32 6.0, %v1634_v47  ;;  %1647 = vrcp.f32 %v958_v61  ;;  %v987_v34 = vmin.f32 %v985_v39, 6.0 }
 0x25f   : > { %v1638_v40 = vpop.eup %1637  ;;  %v2471_v41 = vsel %vm2457_vm15, 0.0, %v840_v48  ;;  %v872_v42 = vmul.f32 6.0, %v1636_v24  ;;  %v988_v43 = vmin.f32 %v986_v9, 6.0  ;;  %v1015_v50 = vmax.f32 %v1013_v15, 0.0 }
 0x260   : > { %v1640_v44 = vpop.eup %1639  ;;  %v2475_v59 = vsel %vm2457_vm15, 0.0, %v870_v17  ;;  %v900_v7 = vmul.f32 6.0, %v1638_v40  ;;  %1649 = vrcp.f32 %v987_v34  ;;  %v1016_v6 = vmax.f32 %v1014_v38, 0.0 }
 0x261   : > { %v1642_v51 = vpop.eup %1641  ;;  %v2479_v8 = vsel %vm2446_vm14, 0.0, %v872_v42  ;;  %v902_v20 = vmul.f32 6.0, %v1640_v44  ;;  %1651 = vrcp.f32 %v988_v43  ;;  %v1017_v1 = vmin.f32 %v1015_v50, 6.0 }
 0x262   : > { %v1644_v5 = vpop.eup %1643  ;;  %v2483_v19 = vsel %vm2457_vm15, 0.0, %v900_v7  ;;  %v930_v45 = vmul.f32 6.0, %v1642_v51  ;;  %v1018_v21 = vmin.f32 %v1016_v6, 6.0  ;;  %v1038_v52 = vmul.f32 %v2319_v37, %v1036_v58 }
 0x263   : > { %v2490_v60 = vsel %vm2446_vm14, 0.0, %v902_v20  ;;  %v932_v0 = vmul.f32 6.0, %v1644_v5  ;;  %1653 = vrcp.f32 %v1017_v1  ;;  %v1039_v14 = vadd.f32 %v1037_v56, %v1033_v16 }
 0x264   : > { %v2494_v27 = vsel %vm2457_vm15, 0.0, %v930_v45  ;;  %1655 = vrcp.f32 %v1018_v21  ;;  %v1040_v35 = vadd.f32 %v1038_v52, %v1034_v3  ;;  %v2947_v53 = vstv %s2886_s14  ;;  %s2956_s14 = sld [smem:[#allocation59_spill]] }
 0x265   : > { %v1057_v63 = vmul.f32 %v2947_v53, %v2471_v41  ;;  %v2501_v58 = vsel %vm2446_vm14, 0.0, %v932_v0  ;;  %v2948_v37 = vstv %s2885_s9  ;;  %v2949_v25 = vmov %v2947_v53  ;;  %s2966_s9 = sld [smem:[#allocation57_spill]] }
 0x266   : > { %v1043_v18 = vadd.f32 %v2948_v37, %v1039_v14  ;;  %v1058_v36 = vmul.f32 %v2949_v25, %v2467_v4  ;;  %v2950_v2 = vstv %s2944_s22  ;;  %v2951_v54 = vmov %v2948_v37 }
 0x267   : > { %v1061_v46 = vmul.f32 %v2950_v2, %v2475_v59  ;;  %v1044_v10 = vadd.f32 %v2951_v54, %v1040_v35  ;;  %v2952_v12 = vmov %v2950_v2  ;;  %v2953_v28 = vstv %s2945_s30  ;;  %v1646_v55 = vpop.eup %1645 }
 0x268   : > { %v1062_v62 = vmul.f32 %v2952_v12, %v2479_v8  ;;  %v1067_v29 = vmul.f32 %v2953_v28, %v2483_v19  ;;  %v2954_v22 = vmov %v2953_v28  ;;  %v1045_v23 = vmax.f32 %v1043_v18, 0.0  ;;  %v1648_v33 = vpop.eup %1647 }
 0x269   : > { %v1068_v16 = vmul.f32 %v2954_v22, %v2490_v60  ;;  %v1063_v32 = vadd.f32 %v1061_v46, %v1057_v63  ;;  %v2955_v3 = vstv %s2946_s7  ;;  %v960_v56 = vmul.f32 6.0, %v1646_v55 }
 0x26a   : > { %v1073_v49 = vmul.f32 %v2955_v3, %v2494_v27  ;;  %v2957_v30 = vmov %v2955_v3  ;;  %v1046_v13 = vmax.f32 %v1044_v10, 0.0  ;;  %v1064_v26 = vadd.f32 %v1062_v62, %v1058_v36  ;;  %v1650_v24 = vpop.eup %1649 }
 0x26b   : > { %v1074_v31 = vmul.f32 %v2957_v30, %v2501_v58  ;;  %v2958_v61 = vstv %s2131_s2  ;;  %v962_v9 = vmul.f32 6.0, %v1648_v33  ;;  %v1047_v47 = vmin.f32 %v1045_v23, 6.0  ;;  %v1652_v50 = vpop.eup %1651  ;;  %s2962_s2 = sld [smem:[#allocation56_spill]] }
 0x26c   : > { %v1119_v39 = vmul.f32 %v2958_v61, %v2471_v41  ;;  %v1069_v48 = vadd.f32 %v1067_v29, %v1063_v32  ;;  %v2960_v15 = vmov %v2958_v61  ;;  %v2536_v17 = vsel %vm2457_vm15, 0.0, %v960_v56 }
 0x26d   : > { %v1120_v38 = vmul.f32 %v2960_v15, %v2467_v4  ;;  %v1048_v34 = vmin.f32 %v1046_v13, 6.0  ;;  %v1070_v40 = vadd.f32 %v1068_v16, %v1064_v26  ;;  %v2961_v42 = vstv %s2956_s14  ;;  %v1654_v45 = vpop.eup %1653 }
 0x26e   : > { %v1123_v43 = vmul.f32 %v2961_v42, %v2475_v59  ;;  %v2543_v44 = vsel %vm2446_vm14, 0.0, %v962_v9  ;;  %v990_v7 = vmul.f32 6.0, %v1650_v24  ;;  %1657 = vrcp.f32 %v1047_v47  ;;  %v1656_v63 = vpop.eup %1655 }
 0x26f   : > { %v1075_v6 = vadd.f32 %v1073_v49, %v1069_v48  ;;  %v992_v51 = vmul.f32 6.0, %v1652_v50  ;;  %1659 = vrcp.f32 %v1048_v34  ;;  %v1076_v20 = vadd.f32 %v1074_v31, %v1070_v40 }
 0x270   : > { %v2963_v1 = vstv %s2959_s8  ;;  %v2550_v21 = vsel %vm2457_vm15, 0.0, %v990_v7  ;;  %v2965_v14 = vmov %v2961_v42  ;;  %v1125_v53 = vadd.f32 %v1123_v43, %v1119_v39 }
 0x271   : > { %v1079_v5 = vmul.f32 %v2963_v1, %v2536_v17  ;;  %v2964_v52 = vmov %v2963_v1  ;;  %v1124_v35 = vmul.f32 %v2965_v14, %v2479_v8  ;;  %v2560_v37 = vsel %vm2446_vm14, 0.0, %v992_v51 }
 0x272   : > { %v1080_v0 = vmul.f32 %v2964_v52, %v2543_v44  ;;  %v1020_v18 = vmul.f32 6.0, %v1654_v45  ;;  %v2967_v36 = vstv %s2962_s2  ;;  %v1022_v46 = vmul.f32 6.0, %v1656_v63 }
 0x273   : > { %v1081_v25 = vadd.f32 %v1079_v5, %v1075_v6  ;;  %v1085_v2 = vmul.f32 %v2967_v36, %v2550_v21  ;;  %v2968_v10 = vmov %v2967_v36  ;;  %v1126_v62 = vadd.f32 %v1124_v35, %v1120_v38 }
 0x274   : > { %v1082_v54 = vadd.f32 %v1080_v0, %v1076_v20  ;;  %v1086_v12 = vmul.f32 %v2968_v10, %v2560_v37  ;;  %v2570_v28 = vsel %vm2457_vm15, 0.0, %v1020_v18  ;;  %v2969_v22 = vstv %s2135_s6  ;;  %s2984_s6 = sld [smem:[#allocation61_spill]] }
 0x275   : > { %v1087_v29 = vadd.f32 %v1085_v2, %v1081_v25  ;;  %v1129_v16 = vmul.f32 %v2969_v22, %v2483_v19  ;;  %v2970_v55 = vmov %v2969_v22  ;;  %v2580_v32 = vsel %vm2446_vm14, 0.0, %v1022_v46 }
 0x276   : > { %v1130_v23 = vmul.f32 %v2970_v55, %v2490_v60  ;;  %v1088_v3 = vadd.f32 %v1086_v12, %v1082_v54  ;;  %v2971_v49 = vstv %s2966_s9  ;;  %v2972_v31 = vstv %s2897_s18 }
 0x277   : > { %v1091_v30 = vmul.f32 %v2971_v49, %v2570_v28  ;;  %v1135_v33 = vmul.f32 %v2972_v31, %v2494_v27  ;;  %v2973_v56 = vmov %v2971_v49  ;;  %v1131_v26 = vadd.f32 %v1129_v16, %v1125_v53 }
 0x278   : > { %v1092_v13 = vmul.f32 %v2973_v56, %v2580_v32  ;;  %v1132_v61 = vadd.f32 %v1130_v23, %v1126_v62  ;;  %v2974_v39 = vmov %v2972_v31  ;;  %v2975_v48 = vstv %s2141_s5  ;;  %v1658_v51 = vpop.eup %1657  ;;  %s2983_s5 = sld [smem:[#allocation58_spill]] }
 0x279   : > { %v1136_v9 = vmul.f32 %v2974_v39, %v2501_v58  ;;  %v1093_v47 = vadd.f32 %v1091_v30, %v1087_v29  ;;  %v1141_v15 = vmul.f32 %v2975_v48, %v2536_v17  ;;  %v2976_v38 = vmov %v2975_v48  ;;  %v1660_v53 = vpop.eup %1659 }
 0x27a   : > { %v1142_v24 = vmul.f32 %v2976_v38, %v2543_v44  ;;  %v2977_v34 = vstv %s2143_s20  ;;  %v1094_v42 = vadd.f32 %v1092_v13, %v1088_v3  ;;  %v1137_v43 = vadd.f32 %v1135_v33, %v1131_v26  ;;  %s2992_s20 = sld [smem:[#allocation42_spill]] }
 0x27b   : > { %v1147_v40 = vmul.f32 %v2977_v34, %v2550_v21  ;;  %v1138_v50 = vadd.f32 %v1136_v9, %v1132_v61  ;;  %v2978_v7 = vmov %v2977_v34  ;;  %v2979_v20 = vstv %s2149_s4  ;;  %s2989_s4 = sld [smem:[#allocation64_spill]] }
 0x27c   : > { %v1148_v6 = vmul.f32 %v2978_v7, %v2560_v37  ;;  %v1153_v1 = vmul.f32 %v2979_v20, %v2570_v28  ;;  %v2980_v5 = vmov %v2979_v20  ;;  %v2981_v52 = vstv %s2157_s27  ;;  %s2996_s27 = sld [smem:[#allocation51_spill]] }
 0x27d   : > { %v1154_v45 = vmul.f32 %v2980_v5, %v2580_v32  ;;  %v1180_v0 = vmul.f32 %v2981_v52, %v2471_v41  ;;  %v2982_v14 = vmov %v2981_v52  ;;  %v1050_v63 = vmul.f32 6.0, %v1658_v51 }
 0x27e   : > { %v1181_v35 = vmul.f32 %v2982_v14, %v2467_v4  ;;  %v1143_v18 = vadd.f32 %v1141_v15, %v1137_v43  ;;  %v1144_v25 = vadd.f32 %v1142_v24, %v1138_v50  ;;  %v2985_v36 = vstv %s2898_s26  ;;  %s2998_s26 = sld [smem:[#allocation49_spill]] }
 0x27f   : > { %v1184_v2 = vmul.f32 %v2985_v36, %v2475_v59  ;;  %v1052_v46 = vmul.f32 6.0, %v1660_v53  ;;  %v2986_v54 = vmov %v2985_v36  ;;  %v2987_v41 = vstv %s2900_s3  ;;  %s2994_s3 = sld [smem:[#allocation47_spill]] }
 0x280   : > { %v1185_v10 = vmul.f32 %v2986_v54, %v2479_v8  ;;  %v1190_v12 = vmul.f32 %v2987_v41, %v2483_v19  ;;  %v2988_v62 = vmov %v2987_v41  ;;  %v1053_v29 = vsel %vm2457_vm15, 0.0, %v1050_v63 }
 0x281   : > { %v1191_v4 = vmul.f32 %v2988_v62, %v2490_v60  ;;  %v1149_v22 = vadd.f32 %v1147_v40, %v1143_v18  ;;  %v1150_v16 = vadd.f32 %v1148_v6, %v1144_v25  ;;  %v1186_v55 = vadd.f32 %v1184_v2, %v1180_v0 }
 0x282   : > { %v1054_v59 = vsel %vm2446_vm14, 0.0, %v1052_v46  ;;  %v2990_v23 = vstv %s2983_s5  ;;  %v2991_v8 = vstv %s2984_s6  ;;  %v1187_v19 = vadd.f32 %v1185_v10, %v1181_v35 }
 0x283   : > { %v1097_v3 = vmul.f32 %v2990_v23, %v1053_v29  ;;  %v1159_v49 = vmul.f32 %v2991_v8, %v1053_v29  ;;  %v2993_v30 = vmov %v2990_v23  ;;  %v1155_v11 = vadd.f32 %v1153_v1, %v1149_v22 }
 0x284   : > { %v1098_v60 = vmul.f32 %v2993_v30, %v1054_v59  ;;  %v1156_v31 = vadd.f32 %v1154_v45, %v1150_v16  ;;  %v2995_v33 = vmov %v2991_v8  ;;  %v1192_v13 = vadd.f32 %v1190_v12, %v1186_v55 }
 0x285   : > { %v1160_v56 = vmul.f32 %v2995_v33, %v1054_v59  ;;  %v1099_v57 = vadd.f32 %v1097_v3, %v1093_v47  ;;  %v1193_v26 = vadd.f32 %v1191_v4, %v1187_v19  ;;  %v2997_v61 = vstv %s2989_s4 }
 0x286   : > { %v1196_v39 = vmul.f32 %v2997_v61, %v2494_v27  ;;  %v1100_v9 = vadd.f32 %v1098_v60, %v1094_v42  ;;  %v1161_v48 = vadd.f32 %v1159_v49, %v1155_v11  ;;  %v2999_v38 = vmov %v2997_v61 }
 0x287   : > { %v1162_v15 = vadd.f32 %v1160_v56, %v1156_v31  ;;  %v1197_v24 = vmul.f32 %v2999_v38, %v2501_v58  ;;  %v3000_v34 = vstv %s2992_s20  ;;  %v3002_v47 = vstv %s2994_s3 }
 0x288   : > { %v1103_v40 = vadd.f32 %v3000_v34, %v1099_v57  ;;  %v1198_v43 = vadd.f32 %v1196_v39, %v1192_v13  ;;  %v1202_v50 = vmul.f32 %v3002_v47, %v2536_v17  ;;  %v3003_v7 = vmov %v3002_v47 }
 0x289   : > { %v1203_v27 = vmul.f32 %v3003_v7, %v2543_v44  ;;  %v3004_v6 = vmov %v3000_v34  ;;  %v3006_v51 = vstv %s2996_s27  ;;  %v1199_v5 = vadd.f32 %v1197_v24, %v1193_v26 }
 0x28a   : > { %v1104_v42 = vadd.f32 %v3004_v6, %v1100_v9  ;;  %v1165_v20 = vadd.f32 %v3006_v51, %v1161_v48  ;;  %v3007_v1 = vmov %v3006_v51  ;;  %v1105_v45 = vmax.f32 %v1103_v40, 0.0 }
 0x28b   : > { %v1166_v58 = vadd.f32 %v3007_v1, %v1162_v15  ;;  %v1204_v52 = vadd.f32 %v1202_v50, %v1198_v43  ;;  %v3008_v0 = vstv %s2998_s26  ;;  %v1205_v18 = vadd.f32 %v1203_v27, %v1199_v5 }
 0x28c   : > { %v1208_v14 = vmul.f32 %v3008_v0, %v2550_v21  ;;  %v3009_v35 = vmov %v3008_v0  ;;  %v1106_v53 = vmax.f32 %v1104_v42, 0.0  ;;  %v1167_v44 = vmax.f32 %v1165_v20, 0.0 }
 0x28d   : > { %v1209_v17 = vmul.f32 %v3009_v35, %v2560_v37  ;;  %v1168_v63 = vmax.f32 %v1166_v58, 0.0  ;;  %v1107_v25 = vmin.f32 %v1105_v45, 6.0  ;;  %v3011_v2 = vstv %s3005_s13 }
 0x28e   : > { %v1210_v36 = vadd.f32 %v1208_v14, %v1204_v52  ;;  %v1214_v46 = vmul.f32 %v3011_v2, %v2570_v28  ;;  %v3012_v21 = vmov %v3011_v2  ;;  %v1108_v10 = vmin.f32 %v1106_v53, 6.0 }
 0x28f   : > { %v1215_v54 = vmul.f32 %v3012_v21, %v2580_v32  ;;  %v1169_v37 = vmin.f32 %v1167_v44, 6.0  ;;  %v1170_v41 = vmin.f32 %v1168_v63, 6.0  ;;  %v1211_v12 = vadd.f32 %v1209_v17, %v1205_v18 }
 0x290   : > { %1661 = vrcp.f32 %v1107_v25  ;;  %v1216_v62 = vadd.f32 %v1214_v46, %v1210_v36  ;;  %v3013_v4 = vstv %s3010_s15  ;;  %v1225_v3 = vstv %s2648_s10 }
 0x291   : > { %v1220_v22 = vmul.f32 %v3013_v4, %v1053_v29  ;;  %1663 = vrcp.f32 %v1108_v10  ;;  %v1217_v16 = vadd.f32 %v1215_v54, %v1211_v12  ;;  %v3014_v55 = vmov %v3013_v4 }
 0x292   : > { %v1221_v23 = vmul.f32 %v3014_v55, %v1054_v59  ;;  %1665 = vrcp.f32 %v1169_v37 }
 0x293   : > { %v1222_v28 = vadd.f32 %v1220_v22, %v1216_v62  ;;  %1667 = vrcp.f32 %v1170_v41 }
 0x294   : > { %v1223_v8 = vadd.f32 %v1221_v23, %v1217_v16 }
 0x295   : > { %v1226_v32 = vadd.f32 %v1225_v3, %v1222_v28 }
 0x296   : > { %v1227_v49 = vadd.f32 %v1225_v3, %v1223_v8 }
 0x297   : > { %v1228_v19 = vmax.f32 %v1226_v32, 0.0 }
 0x298   : > { %v1229_v30 = vmax.f32 %v1227_v49, 0.0 }
 0x299   : > { %v1230_v60 = vmin.f32 %v1228_v19, 6.0 }
 0x29a   : > { %v1231_v11 = vmin.f32 %v1229_v30, 6.0  ;;  %v1662_v31 = vpop.eup %1661 }
 0x29b   : > { %1669 = vrcp.f32 %v1230_v60  ;;  %v1664_v29 = vpop.eup %1663  ;;  %v1110_v59 = vmul.f32 6.0, %v1662_v31 }
 0x29c   : > { %1671 = vrcp.f32 %v1231_v11  ;;  %v1666_v33 = vpop.eup %1665  ;;  %v1112_v56 = vmul.f32 6.0, %v1664_v29 }
 0x29d   : > { %v1668_v57 = vpop.eup %1667  ;;  %1114 = vst.msk [vmem:[%s296_s12] sm:$0xff] %vm1113_vm0, %v1110_v59  ;;  %v1172_v13 = vmul.f32 6.0, %v1666_v33 }
 0x29e   : > { %1116 = vst.msk [vmem:[%s296_s12 + $0x8] sm:$0x3] %vm1115_vm1, %v1112_v56  ;;  %v1174_v26 = vmul.f32 6.0, %v1668_v57 }
 0x29f   : > { %1436 = vst.msk [vmem:[%s296_s12 + $0x10] sm:$0xff] %vm1113_vm0, %v1172_v13 }
 0x2a0   : > { %1437 = vst.msk [vmem:[%s296_s12 + $0x18] sm:$0x3] %vm1115_vm1, %v1174_v26 }
 0x2a5   : > { %v1670_v61 = vpop.eup %1669 }
 0x2a6   : > { %v1672_v39 = vpop.eup %1671  ;;  %v1233_v9 = vmul.f32 6.0, %v1670_v61 }
 0x2a7   : > { %v1235_v48 = vmul.f32 6.0, %v1672_v39 }
 0x2a8   : > { %1447 = vst.msk [vmem:[%s296_s12 + $0x20] sm:$0xff] %vm1113_vm0, %v1233_v9 }
 0x2a9   : > { %1448 = vst.msk [vmem:[%s296_s12 + $0x28] sm:$0x3] %vm1115_vm1, %v1235_v48 }
 0x2aa PF: > { %s3016_s21 = sld [smem:[#allocation18_spill]]  ;;  %s3017_s18 = sld [smem:[#allocation15_spill]] }
 0x2ab   : > { %s3018_s19 = sld [smem:[#allocation16_spill]]  ;;  %s3019_s20 = sld [smem:[#allocation19_spill]] }
 0x2b0   : > { %p18_p4 = scmp.ge.s32.totalorder %s3016_s21, 4  }
 0x2b2   :  { %20 = sbr.rel (!%p18_p4) target bundleno = 13 (0xd), region = 101 }
 0x2b9   :  { %1260 = vsyncpa [#allocation3], 1 }
 0x2ba   :  { %1262 = vsyncpa [#allocation3 + $0x1], 1 }
 0x2bb   :  { %1263 = vsyncpa [#allocation4], 1 }
 0x2bc   :  { %1265 = vsyncpa [#allocation4 + $0x1], 1 }
 0x2bd   :  { %1266 = vsyncpa [#allocation7], 1 }
 0x2be   :  { %1267 = vsyncpa [#allocation10], 1 }

</bundles_post_ra>
